<compile_context>
chip_gen: v7x
topology: tpu7x:2x2x1
jax: 0.10.0
libtpu: 0.0.40
codegen_flags: <defaults>
</compile_context>

<pallas_src>
import functools

import jax
import jax.numpy as jnp
from jax import lax
from jax.experimental import pallas as pl
from jax.experimental.pallas import tpu as pltpu


def _round_up(x, m):
    return ((x + m - 1) // m) * m


# ----------------------------------------------------------------------------
# Fused Pallas kernel: the entire residual block, `bb` batch samples per step.
# ----------------------------------------------------------------------------
def _block_kernel(x_ref, wa_ref, ash_ref, wt_ref, tsh_ref, wf_ref, fsh_ref,
                  wcb_ref, csh_ref, o_ref, hp_ref, *,
                  N, F, Cin, Ci, Cout, Kt, Kf, bb, lead):
    """Refs:
       x_ref  : (bb, Cin, N)      lane-dense input block, N = T*F          (VMEM)
       wa_ref : (Cin, Ci, 1)      1x1 conv a (BN scale folded)             (VMEM)
       ash_ref: (Ci, 1)           BN shift of conv a
       wt_ref : (Kt, Ci, 1)       merged multi-scale temporal DW weights
       tsh_ref: (Ci, 1)           summed temporal BN shifts
       wf_ref : (Kf, Ci, 1)       merged multi-scale frequency DW weights
       fsh_ref: (Ci, 1)           summed frequency BN shifts
       wcb_ref: (Cin+Ci, Cout, 1) [branch1|identity ; branch2.c] merged
       csh_ref: (Cout, 1)         combined output shift
       o_ref  : (bb, Cout, N)     lane-dense output block                  (VMEM)
       hp_ref : (Ci, LT)          flat zero-padded canvas (scratch).  Interior is
                                  [lead, lead+N); the halo is never written (it is
                                  the conv zero padding).
    """
    pT, pF = Kt // 2, Kf // 2
    LT = hp_ref.shape[1]
    EXT = N + 2 * pF                       # temporal result over q in [-pF, N+pF)

    # Re-zero only the halo strips each step (cheap, and safe even when the
    # "parallel" batch grid is sharded across TensorCores, where program_id == 0
    # might never run on a given core).  The interior is overwritten below.
    if lead > 0:
        hp_ref[:, 0:lead] = jnp.zeros((Ci, lead), jnp.float32)
    if LT > lead + N:
        hp_ref[:, lead + N:LT] = jnp.zeros((Ci, LT - lead - N), jnp.float32)

    # Hoist the tiny per-channel weight columns (sample independent).
    wa_cols = [wa_ref[ci] for ci in range(Cin)]            # each (Ci, 1)
    wt_cols = [wt_ref[j] for j in range(Kt)]               # each (Ci, 1)
    wf_cols = [wf_ref[i] for i in range(Kf)]               # each (Ci, 1)
    wcb_cols = [wcb_ref[k] for k in range(Cin + Ci)]       # each (Cout, 1)
    ash = ash_ref[...]                                     # (Ci, 1)
    tsh = tsh_ref[...]
    fsh = fsh_ref[...]
    csh = csh_ref[...]                                     # (Cout, 1)

    # In-register zero-padding masks for the frequency taps (column index in row).
    col = lax.broadcasted_iota(jnp.int32, (1, N), 1)
    if F & (F - 1) == 0:
        fcol = lax.bitwise_and(col, F - 1)
    else:
        fcol = col % F
    fmask = [(fcol >= (pF - i)) & (fcol < (F + pF - i)) for i in range(Kf)]

    for b in range(bb):
        # (1, N) rows of this sample, reused by stage a and the residual stage.
        x_rows = [x_ref[b, ci:ci + 1, :] for ci in range(Cin)]

        # ---- branch2.a : 1x1 conv + folded BN + ReLU (vectorised over Ci) ------
        h = wa_cols[0] * x_rows[0]
        for ci in range(1, Cin):
            h = h + wa_cols[ci] * x_rows[ci]
        h = jnp.maximum(h + ash, 0.0)                      # (Ci, N)

        # Write the interior; the untouched halo is the (pT, pF) zero padding.
        hp_ref[:, lead:lead + N] = h
        p = hp_ref[...]                                    # (Ci, LT) - ONE load

        # ---- merged multi-scale temporal depthwise (Kt x 1) + shifts -----------
        # Taps are static lane slices of the padded row (offsets multiple of F),
        # computed over the extended range so the frequency taps become slices.
        base = lead - pF - pT * F
        tE = wt_cols[0] * p[:, base:base + EXT]
        for j in range(1, Kt):
            off = base + j * F
            tE = tE + wt_cols[j] * p[:, off:off + EXT]
        tE = tE + tsh                                      # (Ci, N + 2*pF)

        # ---- merged multi-scale frequency depthwise (1 x Kf) + shifts + ReLU ---
        fa = None
        for i in range(Kf):
            tap = tE[:, i:i + N]
            if i != pF:                                    # centre tap needs no mask
                tap = jnp.where(fmask[i], tap, 0.0)
            term = wf_cols[i] * tap
            fa = term if fa is None else fa + term
        h2 = jnp.maximum(fa + fsh, 0.0)                    # (Ci, N)

        # Stage h2 through the canvas interior so the residual can read clean
        # (1, N) per-channel rows (halo invariant still holds).
        hp_ref[:, lead:lead + N] = h2

        # ---- fused residual: branch1(x)/identity + branch2.c(h2), ReLU ---------
        acc = wcb_cols[0] * x_rows[0]
        for ci in range(1, Cin):
            acc = acc + wcb_cols[ci] * x_rows[ci]
        for c in range(Ci):
            acc = acc + wcb_cols[Cin + c] * hp_ref[c:c + 1, lead:lead + N]
        o_ref[b] = jnp.maximum(acc + csh, 0.0)             # dense (Cout, N) store


# ----------------------------------------------------------------------------
# Wrapper: one pallas_call, NCHW in / NCHW out, all params folded ahead of time.
# ----------------------------------------------------------------------------
def _auto_samples_per_step(batch):
    # Single-TensorCore chips (v5e / v6e): fold the batch into one grid step to
    # avoid per-step overhead.  Multi-core chips (v4/v5p megacore, v7x dual-TC)
    # keep one sample per step so the parallel grid feeds every core.
    try:
        kind = jax.devices()[0].device_kind.lower()
    except Exception:
        return 1
    single_tc = ("lite" in kind) or ("v5e" in kind) or ("v6e" in kind)
    return batch if single_tc else 1


def audio_repinceptionnext_block(x_nchw, kp, *, has_branch1, samples_per_step=None):
    B, Cin, T, F = x_nchw.shape
    Ci = kp["a_w"].shape[1]
    Cout = kp["c_w"].shape[1]
    Kt = kp["t_w"].shape[0]
    Kf = kp["f_w"].shape[0]
    pT, pF = Kt // 2, Kf // 2
    N = T * F

    # Flat canvas geometry: interior starts at a 128-lane-aligned offset.
    lead = _round_up(pT * F + pF, 128)
    LT = _round_up(lead + N + pT * F + pF, 128)

    # Merge the residual shortcut and branch2.c into one (Cin+Ci, Cout) weight.
    if has_branch1:
        w_res = kp["b1_w"]                         # BN scale already folded
        b_res = kp["b1_shift"]
    else:
        assert Cin == Cout, "identity shortcut requires dim_in == dim_out"
        w_res = jnp.eye(Cin, dtype=jnp.float32)
        b_res = jnp.zeros((Cout,), jnp.float32)
    wcb = jnp.concatenate([w_res, kp["c_w"]], axis=0).reshape(Cin + Ci, Cout, 1)
    csh = (b_res + kp["c_shift"]).reshape(Cout, 1)

    wa = kp["a_w"].reshape(Cin, Ci, 1)
    ash = kp["a_shift"].reshape(Ci, 1)
    wt = kp["t_w"].reshape(Kt, Ci, 1)
    tsh = kp["t_bias"].reshape(Ci, 1)
    wf = kp["f_w"].reshape(Kf, Ci, 1)
    fsh = kp["f_bias"].reshape(Ci, 1)

    bb = samples_per_step if samples_per_step is not None else _auto_samples_per_step(B)
    if bb < 1 or B % bb != 0:
        bb = 1

    x_flat = x_nchw.reshape(B, Cin, N)             # lane-dense I/O layout

    def _full(shape):
        return pl.BlockSpec(shape, lambda *_: (0,) * len(shape))

    kern = functools.partial(_block_kernel, N=N, F=F, Cin=Cin, Ci=Ci, Cout=Cout,
                             Kt=Kt, Kf=Kf, bb=bb, lead=lead)

    out_flat = pl.pallas_call(
        kern,
        out_shape=jax.ShapeDtypeStruct((B, Cout, N), jnp.float32),
        grid=(B // bb,),
        in_specs=[
            pl.BlockSpec((bb, Cin, N), lambda i: (i, 0, 0)),   # x (VMEM, lane dense)
            _full((Cin, Ci, 1)), _full((Ci, 1)),               # wa, a_shift
            _full((Kt, Ci, 1)), _full((Ci, 1)),                # temporal DW, shift
            _full((Kf, Ci, 1)), _full((Ci, 1)),                # frequency DW, shift
            _full((Cin + Ci, Cout, 1)), _full((Cout, 1)),      # merged residual
        ],
        out_specs=pl.BlockSpec((bb, Cout, N), lambda i: (i, 0, 0)),
        scratch_shapes=[pltpu.VMEM((Ci, LT), jnp.float32)],
        compiler_params=pltpu.CompilerParams(dimension_semantics=("parallel",)),
    )(x_flat, wa, ash, wt, tsh, wf, fsh, wcb, csh)
    return out_flat.reshape(B, Cout, T, F)


# ----------------------------------------------------------------------------
# Deterministic parameter init (PyTorch-shaped) + BN folding / branch merging
# ----------------------------------------------------------------------------
def init_raw_params(key, dim_in, dim_out, dim_inner, kt_sizes, kf_sizes, has_branch1):
    keys = iter(jax.random.split(key, 64))

    def conv(shape):
        return 0.1 * jax.random.normal(next(keys), shape, jnp.float32)

    def bn(c):
        return dict(
            gamma=1.0 + 0.1 * jax.random.normal(next(keys), (c,), jnp.float32),
            beta=0.1 * jax.random.normal(next(keys), (c,), jnp.float32),
            mean=0.1 * jax.random.normal(next(keys), (c,), jnp.float32),
            var=1.0 + 0.1 * jnp.abs(jax.random.normal(next(keys), (c,), jnp.float32)),
        )

    p = {}
    if has_branch1:
        p["branch1_w"] = conv((dim_out, dim_in, 1, 1))
        p["branch1_bn"] = bn(dim_out)
    p["a_w"] = conv((dim_inner, dim_in, 1, 1))
    p["a_bn"] = bn(dim_inner)
    p["t_w"] = [conv((dim_inner, 1, k, 1)) for k in kt_sizes]
    p["t_bn"] = [bn(dim_inner) for _ in kt_sizes]
    p["f_w"] = [conv((dim_inner, 1, 1, k)) for k in kf_sizes]
    p["f_bn"] = [bn(dim_inner) for _ in kf_sizes]
    p["c_w"] = conv((dim_out, dim_inner, 1, 1))
    p["c_bn"] = bn(dim_out)
    return p


def _bn_fold(b, eps):
    scale = b["gamma"] / jnp.sqrt(b["var"] + eps)
    shift = b["beta"] - b["mean"] * scale
    return scale, shift


def fold_params(raw, eps, kt_sizes, kf_sizes):
    """Fold eval-mode BN into conv weights and merge multi-scale DW branches."""
    ci = raw["a_w"].shape[0]
    kp = {}

    s, t = _bn_fold(raw["a_bn"], eps)
    kp["a_w"] = raw["a_w"][:, :, 0, 0].T * s[None, :]            # (Cin, Ci)
    kp["a_shift"] = t

    def merge(ws, bns, ks):
        assert all(k % 2 == 1 for k in ks)
        kmax = max(ks)
        w_eff = jnp.zeros((kmax, ci), jnp.float32)
        shift = jnp.zeros((ci,), jnp.float32)
        for w, b, k in zip(ws, bns, ks):
            sc, sh = _bn_fold(b, eps)
            off = (kmax - k) // 2
            w_eff = w_eff.at[off:off + k].add(w * sc[None, :])
            shift = shift + sh
        return w_eff, shift

    t_ws = [w[:, 0, :, 0].T for w in raw["t_w"]]                 # (k, Ci)
    kp["t_w"], kp["t_bias"] = merge(t_ws, raw["t_bn"], kt_sizes)
    f_ws = [w[:, 0, 0, :].T for w in raw["f_w"]]                 # (k, Ci)
    kp["f_w"], kp["f_bias"] = merge(f_ws, raw["f_bn"], kf_sizes)

    s, t = _bn_fold(raw["c_bn"], eps)
    kp["c_w"] = raw["c_w"][:, :, 0, 0].T * s[None, :]            # (Ci, Cout)
    kp["c_shift"] = t

    if "branch1_w" in raw:
        s, t = _bn_fold(raw["branch1_bn"], eps)
        kp["b1_w"] = raw["branch1_w"][:, :, 0, 0].T * s[None, :]  # (Cin, Cout)
        kp["b1_shift"] = t
    return kp


# ----------------------------------------------------------------------------
# Pure-JAX reference (NCHW, matches the PyTorch module in eval mode)
# ----------------------------------------------------------------------------
def _conv2d(x, w, padding=(0, 0), groups=1):
    return lax.conv_general_dilated(
        x, w, window_strides=(1, 1),
        padding=[(padding[0], padding[0]), (padding[1], padding[1])],
        dimension_numbers=("NCHW", "OIHW", "NCHW"),
        feature_group_count=groups,
        precision=lax.Precision.HIGHEST)


def _bn_eval(x, b, eps):
    s, t = _bn_fold(b, eps)
    return x * s[None, :, None, None] + t[None, :, None, None]


def reference_forward(x, raw, kt_sizes, kf_sizes, eps, has_branch1):
    h = jnp.maximum(_bn_eval(_conv2d(x, raw["a_w"]), raw["a_bn"], eps), 0.0)
    ci = h.shape[1]
    t_out = 0.0
    for w, b, k in zip(raw["t_w"], raw["t_bn"], kt_sizes):
        t_out = t_out + _bn_eval(_conv2d(h, w, padding=(k // 2, 0), groups=ci), b, eps)
    f_out = 0.0
    for w, b, k in zip(raw["f_w"], raw["f_bn"], kf_sizes):
        f_out = f_out + _bn_eval(_conv2d(t_out, w, padding=(0, k // 2), groups=ci), b, eps)
    h2 = jnp.maximum(f_out, 0.0)
    b2 = _bn_eval(_conv2d(h2, raw["c_w"]), raw["c_bn"], eps)
    if has_branch1:
        b1 = _bn_eval(_conv2d(x, raw["branch1_w"]), raw["branch1_bn"], eps)
    else:
        b1 = x
    return jnp.maximum(b1 + b2, 0.0)


# ----------------------------------------------------------------------------
if __name__ == "__main__":
    eps = 1e-5

    def _mid(k):
        m = k // 2
        return m if m % 2 == 1 else m + 1

    def run_case(seed, B, dim_in, dim_out, dim_inner, T, F, tk, fk):
        kt_sizes = (tk, _mid(tk), 3)
        kf_sizes = (fk, _mid(fk), 3)
        key = jax.random.PRNGKey(seed)
        kx, kparams = jax.random.split(key)
        x = jax.random.normal(kx, (B, dim_in, T, F), jnp.float32)
        has_branch1 = (dim_in != dim_out)          # stride == (1, 1) here
        raw = init_raw_params(kparams, dim_in, dim_out, dim_inner,
                              kt_sizes, kf_sizes, has_branch1)
        kp = fold_params(raw, eps, kt_sizes, kf_sizes)

        out = audio_repinceptionnext_block(x, kp, has_branch1=has_branch1)
        out = jax.block_until_ready(out)
        assert out.shape == (B, dim_out, T, F)

        ref = reference_forward(x, raw, kt_sizes, kf_sizes, eps, has_branch1)
        max_err = float(jnp.max(jnp.abs(out - ref)))
        assert max_err < 1e-2, f"max abs error {max_err}"

    # projection-shortcut config (dim_in != dim_out -> branch1 present)
    run_case(0, B=2, dim_in=4, dim_out=8, dim_inner=4, T=16, F=16, tk=9, fk=9)
    # identity-shortcut config (dim_in == dim_out -> no branch1)
    run_case(1, B=2, dim_in=4, dim_out=4, dim_inner=4, T=16, F=16, tk=9, fk=9)

    print("KERNEL_OK")
</pallas_src>

<mosaic_0001>
module attributes {stable_mosaic.version = 11 : i64} {
  func.func @_block_kernel(%arg0: i32, %arg1: memref<1x4x256xf32, #tpu.memory_space<vmem>>, %arg2: memref<4x4x1xf32, #tpu.memory_space<vmem>>, %arg3: memref<4x1xf32, #tpu.memory_space<vmem>>, %arg4: memref<9x4x1xf32, #tpu.memory_space<vmem>>, %arg5: memref<4x1xf32, #tpu.memory_space<vmem>>, %arg6: memref<9x4x1xf32, #tpu.memory_space<vmem>>, %arg7: memref<4x1xf32, #tpu.memory_space<vmem>>, %arg8: memref<8x8x1xf32, #tpu.memory_space<vmem>>, %arg9: memref<8x1xf32, #tpu.memory_space<vmem>>, %arg10: memref<1x8x256xf32, #tpu.memory_space<vmem>>, %arg11: memref<4x512xf32, #tpu.memory_space<vmem>>) attributes {dimension_semantics = [#tpu.dimension_semantics<parallel>], iteration_bounds = array<i64: 2>, scalar_prefetch = 0 : i64, scratch_operands = 1 : i64, tpu.core_type = #tpu.core_type<tc>, window_params = [{transform_indices = @transform_0, window_bounds = array<i64: 1, 4, 256>}, {pipeline_mode = #tpu.pipeline_mode<synchronous>, transform_indices = @transform_1, window_bounds = array<i64: 4, 4, 1>}, {pipeline_mode = #tpu.pipeline_mode<synchronous>, transform_indices = @transform_2, window_bounds = array<i64: 4, 1>}, {pipeline_mode = #tpu.pipeline_mode<synchronous>, transform_indices = @transform_3, window_bounds = array<i64: 9, 4, 1>}, {pipeline_mode = #tpu.pipeline_mode<synchronous>, transform_indices = @transform_4, window_bounds = array<i64: 4, 1>}, {pipeline_mode = #tpu.pipeline_mode<synchronous>, transform_indices = @transform_5, window_bounds = array<i64: 9, 4, 1>}, {pipeline_mode = #tpu.pipeline_mode<synchronous>, transform_indices = @transform_6, window_bounds = array<i64: 4, 1>}, {pipeline_mode = #tpu.pipeline_mode<synchronous>, transform_indices = @transform_7, window_bounds = array<i64: 8, 8, 1>}, {pipeline_mode = #tpu.pipeline_mode<synchronous>, transform_indices = @transform_8, window_bounds = array<i64: 8, 1>}, {transform_indices = @transform_9, window_bounds = array<i64: 1, 8, 256>}]} {
    %cst = arith.constant 0.000000e+00 : f32
    %0 = vector.broadcast %cst : f32 to vector<4x128xf32>
    %c0 = arith.constant 0 : index
    %c0_0 = arith.constant 0 : index
    %1 = vector.load %arg11[%c0, %c0_0] : memref<4x512xf32, #tpu.memory_space<vmem>>, vector<4x128xf32>
    tpu.vector_store %arg11[%c0, %c0_0], %0 {strides = array<i32>} : memref<4x512xf32, #tpu.memory_space<vmem>>, vector<4x128xf32>,
    %cst_1 = arith.constant 0.000000e+00 : f32
    %2 = vector.broadcast %cst_1 : f32 to vector<4x128xf32>
    %c0_2 = arith.constant 0 : index
    %c384 = arith.constant 384 : index
    %3 = vector.load %arg11[%c0_2, %c384] : memref<4x512xf32, #tpu.memory_space<vmem>>, vector<4x128xf32>
    tpu.vector_store %arg11[%c0_2, %c384], %2 {strides = array<i32>} : memref<4x512xf32, #tpu.memory_space<vmem>>, vector<4x128xf32>,
    %c0_3 = arith.constant 0 : index
    %c0_4 = arith.constant 0 : index
    %c0_5 = arith.constant 0 : index
    %4 = vector.load %arg2[%c0_3, %c0_4, %c0_5] : memref<4x4x1xf32, #tpu.memory_space<vmem>>, vector<1x4x1xf32>
    %5 = vector.shape_cast %4 : vector<1x4x1xf32> to vector<4x1xf32>
    %c1 = arith.constant 1 : index
    %c0_6 = arith.constant 0 : index
    %c0_7 = arith.constant 0 : index
    %6 = vector.load %arg2[%c1, %c0_6, %c0_7] : memref<4x4x1xf32, #tpu.memory_space<vmem>>, vector<1x4x1xf32>
    %7 = vector.shape_cast %6 : vector<1x4x1xf32> to vector<4x1xf32>
    %c2 = arith.constant 2 : index
    %c0_8 = arith.constant 0 : index
    %c0_9 = arith.constant 0 : index
    %8 = vector.load %arg2[%c2, %c0_8, %c0_9] : memref<4x4x1xf32, #tpu.memory_space<vmem>>, vector<1x4x1xf32>
    %9 = vector.shape_cast %8 : vector<1x4x1xf32> to vector<4x1xf32>
    %c3 = arith.constant 3 : index
    %c0_10 = arith.constant 0 : index
    %c0_11 = arith.constant 0 : index
    %10 = vector.load %arg2[%c3, %c0_10, %c0_11] : memref<4x4x1xf32, #tpu.memory_space<vmem>>, vector<1x4x1xf32>
    %11 = vector.shape_cast %10 : vector<1x4x1xf32> to vector<4x1xf32>
    %c0_12 = arith.constant 0 : index
    %c0_13 = arith.constant 0 : index
    %c0_14 = arith.constant 0 : index
    %12 = vector.load %arg4[%c0_12, %c0_13, %c0_14] : memref<9x4x1xf32, #tpu.memory_space<vmem>>, vector<1x4x1xf32>
    %13 = vector.shape_cast %12 : vector<1x4x1xf32> to vector<4x1xf32>
    %c1_15 = arith.constant 1 : index
    %c0_16 = arith.constant 0 : index
    %c0_17 = arith.constant 0 : index
    %14 = vector.load %arg4[%c1_15, %c0_16, %c0_17] : memref<9x4x1xf32, #tpu.memory_space<vmem>>, vector<1x4x1xf32>
    %15 = vector.shape_cast %14 : vector<1x4x1xf32> to vector<4x1xf32>
    %c2_18 = arith.constant 2 : index
    %c0_19 = arith.constant 0 : index
    %c0_20 = arith.constant 0 : index
    %16 = vector.load %arg4[%c2_18, %c0_19, %c0_20] : memref<9x4x1xf32, #tpu.memory_space<vmem>>, vector<1x4x1xf32>
    %17 = vector.shape_cast %16 : vector<1x4x1xf32> to vector<4x1xf32>
    %c3_21 = arith.constant 3 : index
    %c0_22 = arith.constant 0 : index
    %c0_23 = arith.constant 0 : index
    %18 = vector.load %arg4[%c3_21, %c0_22, %c0_23] : memref<9x4x1xf32, #tpu.memory_space<vmem>>, vector<1x4x1xf32>
    %19 = vector.shape_cast %18 : vector<1x4x1xf32> to vector<4x1xf32>
    %c4 = arith.constant 4 : index
    %c0_24 = arith.constant 0 : index
    %c0_25 = arith.constant 0 : index
    %20 = vector.load %arg4[%c4, %c0_24, %c0_25] : memref<9x4x1xf32, #tpu.memory_space<vmem>>, vector<1x4x1xf32>
    %21 = vector.shape_cast %20 : vector<1x4x1xf32> to vector<4x1xf32>
    %c5 = arith.constant 5 : index
    %c0_26 = arith.constant 0 : index
    %c0_27 = arith.constant 0 : index
    %22 = vector.load %arg4[%c5, %c0_26, %c0_27] : memref<9x4x1xf32, #tpu.memory_space<vmem>>, vector<1x4x1xf32>
    %23 = vector.shape_cast %22 : vector<1x4x1xf32> to vector<4x1xf32>
    %c6 = arith.constant 6 : index
    %c0_28 = arith.constant 0 : index
    %c0_29 = arith.constant 0 : index
    %24 = vector.load %arg4[%c6, %c0_28, %c0_29] : memref<9x4x1xf32, #tpu.memory_space<vmem>>, vector<1x4x1xf32>
    %25 = vector.shape_cast %24 : vector<1x4x1xf32> to vector<4x1xf32>
    %c7 = arith.constant 7 : index
    %c0_30 = arith.constant 0 : index
    %c0_31 = arith.constant 0 : index
    %26 = vector.load %arg4[%c7, %c0_30, %c0_31] : memref<9x4x1xf32, #tpu.memory_space<vmem>>, vector<1x4x1xf32>
    %27 = vector.shape_cast %26 : vector<1x4x1xf32> to vector<4x1xf32>
    %c8 = arith.constant 8 : index
    %c0_32 = arith.constant 0 : index
    %c0_33 = arith.constant 0 : index
    %28 = vector.load %arg4[%c8, %c0_32, %c0_33] : memref<9x4x1xf32, #tpu.memory_space<vmem>>, vector<1x4x1xf32>
    %29 = vector.shape_cast %28 : vector<1x4x1xf32> to vector<4x1xf32>
    %c0_34 = arith.constant 0 : index
    %c0_35 = arith.constant 0 : index
    %c0_36 = arith.constant 0 : index
    %30 = vector.load %arg6[%c0_34, %c0_35, %c0_36] : memref<9x4x1xf32, #tpu.memory_space<vmem>>, vector<1x4x1xf32>
    %31 = vector.shape_cast %30 : vector<1x4x1xf32> to vector<4x1xf32>
    %c1_37 = arith.constant 1 : index
    %c0_38 = arith.constant 0 : index
    %c0_39 = arith.constant 0 : index
    %32 = vector.load %arg6[%c1_37, %c0_38, %c0_39] : memref<9x4x1xf32, #tpu.memory_space<vmem>>, vector<1x4x1xf32>
    %33 = vector.shape_cast %32 : vector<1x4x1xf32> to vector<4x1xf32>
    %c2_40 = arith.constant 2 : index
    %c0_41 = arith.constant 0 : index
    %c0_42 = arith.constant 0 : index
    %34 = vector.load %arg6[%c2_40, %c0_41, %c0_42] : memref<9x4x1xf32, #tpu.memory_space<vmem>>, vector<1x4x1xf32>
    %35 = vector.shape_cast %34 : vector<1x4x1xf32> to vector<4x1xf32>
    %c3_43 = arith.constant 3 : index
    %c0_44 = arith.constant 0 : index
    %c0_45 = arith.constant 0 : index
    %36 = vector.load %arg6[%c3_43, %c0_44, %c0_45] : memref<9x4x1xf32, #tpu.memory_space<vmem>>, vector<1x4x1xf32>
    %37 = vector.shape_cast %36 : vector<1x4x1xf32> to vector<4x1xf32>
    %c4_46 = arith.constant 4 : index
    %c0_47 = arith.constant 0 : index
    %c0_48 = arith.constant 0 : index
    %38 = vector.load %arg6[%c4_46, %c0_47, %c0_48] : memref<9x4x1xf32, #tpu.memory_space<vmem>>, vector<1x4x1xf32>
    %39 = vector.shape_cast %38 : vector<1x4x1xf32> to vector<4x1xf32>
    %c5_49 = arith.constant 5 : index
    %c0_50 = arith.constant 0 : index
    %c0_51 = arith.constant 0 : index
    %40 = vector.load %arg6[%c5_49, %c0_50, %c0_51] : memref<9x4x1xf32, #tpu.memory_space<vmem>>, vector<1x4x1xf32>
    %41 = vector.shape_cast %40 : vector<1x4x1xf32> to vector<4x1xf32>
    %c6_52 = arith.constant 6 : index
    %c0_53 = arith.constant 0 : index
    %c0_54 = arith.constant 0 : index
    %42 = vector.load %arg6[%c6_52, %c0_53, %c0_54] : memref<9x4x1xf32, #tpu.memory_space<vmem>>, vector<1x4x1xf32>
    %43 = vector.shape_cast %42 : vector<1x4x1xf32> to vector<4x1xf32>
    %c7_55 = arith.constant 7 : index
    %c0_56 = arith.constant 0 : index
    %c0_57 = arith.constant 0 : index
    %44 = vector.load %arg6[%c7_55, %c0_56, %c0_57] : memref<9x4x1xf32, #tpu.memory_space<vmem>>, vector<1x4x1xf32>
    %45 = vector.shape_cast %44 : vector<1x4x1xf32> to vector<4x1xf32>
    %c8_58 = arith.constant 8 : index
    %c0_59 = arith.constant 0 : index
    %c0_60 = arith.constant 0 : index
    %46 = vector.load %arg6[%c8_58, %c0_59, %c0_60] : memref<9x4x1xf32, #tpu.memory_space<vmem>>, vector<1x4x1xf32>
    %47 = vector.shape_cast %46 : vector<1x4x1xf32> to vector<4x1xf32>
    %c0_61 = arith.constant 0 : index
    %c0_62 = arith.constant 0 : index
    %c0_63 = arith.constant 0 : index
    %48 = vector.load %arg8[%c0_61, %c0_62, %c0_63] : memref<8x8x1xf32, #tpu.memory_space<vmem>>, vector<1x8x1xf32>
    %49 = vector.shape_cast %48 : vector<1x8x1xf32> to vector<8x1xf32>
    %c1_64 = arith.constant 1 : index
    %c0_65 = arith.constant 0 : index
    %c0_66 = arith.constant 0 : index
    %50 = vector.load %arg8[%c1_64, %c0_65, %c0_66] : memref<8x8x1xf32, #tpu.memory_space<vmem>>, vector<1x8x1xf32>
    %51 = vector.shape_cast %50 : vector<1x8x1xf32> to vector<8x1xf32>
    %c2_67 = arith.constant 2 : index
    %c0_68 = arith.constant 0 : index
    %c0_69 = arith.constant 0 : index
    %52 = vector.load %arg8[%c2_67, %c0_68, %c0_69] : memref<8x8x1xf32, #tpu.memory_space<vmem>>, vector<1x8x1xf32>
    %53 = vector.shape_cast %52 : vector<1x8x1xf32> to vector<8x1xf32>
    %c3_70 = arith.constant 3 : index
    %c0_71 = arith.constant 0 : index
    %c0_72 = arith.constant 0 : index
    %54 = vector.load %arg8[%c3_70, %c0_71, %c0_72] : memref<8x8x1xf32, #tpu.memory_space<vmem>>, vector<1x8x1xf32>
    %55 = vector.shape_cast %54 : vector<1x8x1xf32> to vector<8x1xf32>
    %c4_73 = arith.constant 4 : index
    %c0_74 = arith.constant 0 : index
    %c0_75 = arith.constant 0 : index
    %56 = vector.load %arg8[%c4_73, %c0_74, %c0_75] : memref<8x8x1xf32, #tpu.memory_space<vmem>>, vector<1x8x1xf32>
    %57 = vector.shape_cast %56 : vector<1x8x1xf32> to vector<8x1xf32>
    %c5_76 = arith.constant 5 : index
    %c0_77 = arith.constant 0 : index
    %c0_78 = arith.constant 0 : index
    %58 = vector.load %arg8[%c5_76, %c0_77, %c0_78] : memref<8x8x1xf32, #tpu.memory_space<vmem>>, vector<1x8x1xf32>
    %59 = vector.shape_cast %58 : vector<1x8x1xf32> to vector<8x1xf32>
    %c6_79 = arith.constant 6 : index
    %c0_80 = arith.constant 0 : index
    %c0_81 = arith.constant 0 : index
    %60 = vector.load %arg8[%c6_79, %c0_80, %c0_81] : memref<8x8x1xf32, #tpu.memory_space<vmem>>, vector<1x8x1xf32>
    %61 = vector.shape_cast %60 : vector<1x8x1xf32> to vector<8x1xf32>
    %c7_82 = arith.constant 7 : index
    %c0_83 = arith.constant 0 : index
    %c0_84 = arith.constant 0 : index
    %62 = vector.load %arg8[%c7_82, %c0_83, %c0_84] : memref<8x8x1xf32, #tpu.memory_space<vmem>>, vector<1x8x1xf32>
    %63 = vector.shape_cast %62 : vector<1x8x1xf32> to vector<8x1xf32>
    %c0_85 = arith.constant 0 : index
    %c0_86 = arith.constant 0 : index
    %64 = vector.load %arg3[%c0_85, %c0_86] : memref<4x1xf32, #tpu.memory_space<vmem>>, vector<4x1xf32>
    %c0_87 = arith.constant 0 : index
    %c0_88 = arith.constant 0 : index
    %65 = vector.load %arg5[%c0_87, %c0_88] : memref<4x1xf32, #tpu.memory_space<vmem>>, vector<4x1xf32>
    %c0_89 = arith.constant 0 : index
    %c0_90 = arith.constant 0 : index
    %66 = vector.load %arg7[%c0_89, %c0_90] : memref<4x1xf32, #tpu.memory_space<vmem>>, vector<4x1xf32>
    %c0_91 = arith.constant 0 : index
    %c0_92 = arith.constant 0 : index
    %67 = vector.load %arg9[%c0_91, %c0_92] : memref<8x1xf32, #tpu.memory_space<vmem>>, vector<8x1xf32>
    %68 = tpu.iota {dimensions = array<i32: 1>} : vector<1x256xi32>
    %c15_i32 = arith.constant 15 : i32
    %69 = vector.broadcast %c15_i32 : i32 to vector<1x256xi32>
    %70 = arith.andi %68, %69 : vector<1x256xi32>
    %c4_i32 = arith.constant 4 : i32
    %71 = vector.broadcast %c4_i32 : i32 to vector<1x256xi32>
    %72 = arith.cmpi sge, %70, %71 : vector<1x256xi32>
    %c20_i32 = arith.constant 20 : i32
    %73 = vector.broadcast %c20_i32 : i32 to vector<1x256xi32>
    %74 = arith.cmpi slt, %70, %73 : vector<1x256xi32>
    %75 = arith.andi %72, %74 : vector<1x256xi1>
    %c3_i32 = arith.constant 3 : i32
    %76 = vector.broadcast %c3_i32 : i32 to vector<1x256xi32>
    %77 = arith.cmpi sge, %70, %76 : vector<1x256xi32>
    %c19_i32 = arith.constant 19 : i32
    %78 = vector.broadcast %c19_i32 : i32 to vector<1x256xi32>
    %79 = arith.cmpi slt, %70, %78 : vector<1x256xi32>
    %80 = arith.andi %77, %79 : vector<1x256xi1>
    %c2_i32 = arith.constant 2 : i32
    %81 = vector.broadcast %c2_i32 : i32 to vector<1x256xi32>
    %82 = arith.cmpi sge, %70, %81 : vector<1x256xi32>
    %c18_i32 = arith.constant 18 : i32
    %83 = vector.broadcast %c18_i32 : i32 to vector<1x256xi32>
    %84 = arith.cmpi slt, %70, %83 : vector<1x256xi32>
    %85 = arith.andi %82, %84 : vector<1x256xi1>
    %c1_i32 = arith.constant 1 : i32
    %86 = vector.broadcast %c1_i32 : i32 to vector<1x256xi32>
    %87 = arith.cmpi sge, %70, %86 : vector<1x256xi32>
    %c17_i32 = arith.constant 17 : i32
    %88 = vector.broadcast %c17_i32 : i32 to vector<1x256xi32>
    %89 = arith.cmpi slt, %70, %88 : vector<1x256xi32>
    %90 = arith.andi %87, %89 : vector<1x256xi1>
    %c-1_i32 = arith.constant -1 : i32
    %91 = vector.broadcast %c-1_i32 : i32 to vector<1x256xi32>
    %92 = arith.cmpi sge, %70, %91 : vector<1x256xi32>
    %c15_i32_93 = arith.constant 15 : i32
    %93 = vector.broadcast %c15_i32_93 : i32 to vector<1x256xi32>
    %94 = arith.cmpi slt, %70, %93 : vector<1x256xi32>
    %95 = arith.andi %92, %94 : vector<1x256xi1>
    %c-2_i32 = arith.constant -2 : i32
    %96 = vector.broadcast %c-2_i32 : i32 to vector<1x256xi32>
    %97 = arith.cmpi sge, %70, %96 : vector<1x256xi32>
    %c14_i32 = arith.constant 14 : i32
    %98 = vector.broadcast %c14_i32 : i32 to vector<1x256xi32>
    %99 = arith.cmpi slt, %70, %98 : vector<1x256xi32>
    %100 = arith.andi %97, %99 : vector<1x256xi1>
    %c-3_i32 = arith.constant -3 : i32
    %101 = vector.broadcast %c-3_i32 : i32 to vector<1x256xi32>
    %102 = arith.cmpi sge, %70, %101 : vector<1x256xi32>
    %c13_i32 = arith.constant 13 : i32
    %103 = vector.broadcast %c13_i32 : i32 to vector<1x256xi32>
    %104 = arith.cmpi slt, %70, %103 : vector<1x256xi32>
    %105 = arith.andi %102, %104 : vector<1x256xi1>
    %c-4_i32 = arith.constant -4 : i32
    %106 = vector.broadcast %c-4_i32 : i32 to vector<1x256xi32>
    %107 = arith.cmpi sge, %70, %106 : vector<1x256xi32>
    %c12_i32 = arith.constant 12 : i32
    %108 = vector.broadcast %c12_i32 : i32 to vector<1x256xi32>
    %109 = arith.cmpi slt, %70, %108 : vector<1x256xi32>
    %110 = arith.andi %107, %109 : vector<1x256xi1>
    %c0_94 = arith.constant 0 : index
    %c0_95 = arith.constant 0 : index
    %c0_96 = arith.constant 0 : index
    %111 = vector.load %arg1[%c0_94, %c0_95, %c0_96] : memref<1x4x256xf32, #tpu.memory_space<vmem>>, vector<1x1x256xf32>
    %112 = vector.shape_cast %111 : vector<1x1x256xf32> to vector<1x256xf32>
    %c0_97 = arith.constant 0 : index
    %c1_98 = arith.constant 1 : index
    %c0_99 = arith.constant 0 : index
    %113 = vector.load %arg1[%c0_97, %c1_98, %c0_99] : memref<1x4x256xf32, #tpu.memory_space<vmem>>, vector<1x1x256xf32>
    %114 = vector.shape_cast %113 : vector<1x1x256xf32> to vector<1x256xf32>
    %c0_100 = arith.constant 0 : index
    %c2_101 = arith.constant 2 : index
    %c0_102 = arith.constant 0 : index
    %115 = vector.load %arg1[%c0_100, %c2_101, %c0_102] : memref<1x4x256xf32, #tpu.memory_space<vmem>>, vector<1x1x256xf32>
    %116 = vector.shape_cast %115 : vector<1x1x256xf32> to vector<1x256xf32>
    %c0_103 = arith.constant 0 : index
    %c3_104 = arith.constant 3 : index
    %c0_105 = arith.constant 0 : index
    %117 = vector.load %arg1[%c0_103, %c3_104, %c0_105] : memref<1x4x256xf32, #tpu.memory_space<vmem>>, vector<1x1x256xf32>
    %118 = vector.shape_cast %117 : vector<1x1x256xf32> to vector<1x256xf32>
    %119 = vector.broadcast %5 : vector<4x1xf32> to vector<4x256xf32>
    %120 = vector.broadcast %112 : vector<1x256xf32> to vector<4x256xf32>
    %121 = arith.mulf %119, %120 : vector<4x256xf32>
    %122 = vector.broadcast %7 : vector<4x1xf32> to vector<4x256xf32>
    %123 = vector.broadcast %114 : vector<1x256xf32> to vector<4x256xf32>
    %124 = arith.mulf %122, %123 : vector<4x256xf32>
    %125 = arith.addf %121, %124 : vector<4x256xf32>
    %126 = vector.broadcast %9 : vector<4x1xf32> to vector<4x256xf32>
    %127 = vector.broadcast %116 : vector<1x256xf32> to vector<4x256xf32>
    %128 = arith.mulf %126, %127 : vector<4x256xf32>
    %129 = arith.addf %125, %128 : vector<4x256xf32>
    %130 = vector.broadcast %11 : vector<4x1xf32> to vector<4x256xf32>
    %131 = vector.broadcast %118 : vector<1x256xf32> to vector<4x256xf32>
    %132 = arith.mulf %130, %131 : vector<4x256xf32>
    %133 = arith.addf %129, %132 : vector<4x256xf32>
    %134 = vector.broadcast %64 : vector<4x1xf32> to vector<4x256xf32>
    %135 = arith.addf %133, %134 : vector<4x256xf32>
    %cst_106 = arith.constant 0.000000e+00 : f32
    %136 = vector.broadcast %cst_106 : f32 to vector<4x256xf32>
    %137 = arith.maximumf %135, %136 : vector<4x256xf32>
    %c0_107 = arith.constant 0 : index
    %c128 = arith.constant 128 : index
    %138 = vector.load %arg11[%c0_107, %c128] : memref<4x512xf32, #tpu.memory_space<vmem>>, vector<4x256xf32>
    tpu.vector_store %arg11[%c0_107, %c128], %137 {strides = array<i32>} : memref<4x512xf32, #tpu.memory_space<vmem>>, vector<4x256xf32>,
    %c0_108 = arith.constant 0 : index
    %c0_109 = arith.constant 0 : index
    %139 = vector.load %arg11[%c0_108, %c0_109] : memref<4x512xf32, #tpu.memory_space<vmem>>, vector<4x512xf32>
    %140 = vector.extract_strided_slice %139 {offsets = [0, 60], sizes = [4, 264], strides = [1, 1]} : vector<4x512xf32> to vector<4x264xf32>
    %141 = vector.broadcast %13 : vector<4x1xf32> to vector<4x264xf32>
    %142 = arith.mulf %141, %140 : vector<4x264xf32>
    %143 = vector.extract_strided_slice %139 {offsets = [0, 76], sizes = [4, 264], strides = [1, 1]} : vector<4x512xf32> to vector<4x264xf32>
    %144 = vector.broadcast %15 : vector<4x1xf32> to vector<4x264xf32>
    %145 = arith.mulf %144, %143 : vector<4x264xf32>
    %146 = arith.addf %142, %145 : vector<4x264xf32>
    %147 = vector.extract_strided_slice %139 {offsets = [0, 92], sizes = [4, 264], strides = [1, 1]} : vector<4x512xf32> to vector<4x264xf32>
    %148 = vector.broadcast %17 : vector<4x1xf32> to vector<4x264xf32>
    %149 = arith.mulf %148, %147 : vector<4x264xf32>
    %150 = arith.addf %146, %149 : vector<4x264xf32>
    %151 = vector.extract_strided_slice %139 {offsets = [0, 108], sizes = [4, 264], strides = [1, 1]} : vector<4x512xf32> to vector<4x264xf32>
    %152 = vector.broadcast %19 : vector<4x1xf32> to vector<4x264xf32>
    %153 = arith.mulf %152, %151 : vector<4x264xf32>
    %154 = arith.addf %150, %153 : vector<4x264xf32>
    %155 = vector.extract_strided_slice %139 {offsets = [0, 124], sizes = [4, 264], strides = [1, 1]} : vector<4x512xf32> to vector<4x264xf32>
    %156 = vector.broadcast %21 : vector<4x1xf32> to vector<4x264xf32>
    %157 = arith.mulf %156, %155 : vector<4x264xf32>
    %158 = arith.addf %154, %157 : vector<4x264xf32>
    %159 = vector.extract_strided_slice %139 {offsets = [0, 140], sizes = [4, 264], strides = [1, 1]} : vector<4x512xf32> to vector<4x264xf32>
    %160 = vector.broadcast %23 : vector<4x1xf32> to vector<4x264xf32>
    %161 = arith.mulf %160, %159 : vector<4x264xf32>
    %162 = arith.addf %158, %161 : vector<4x264xf32>
    %163 = vector.extract_strided_slice %139 {offsets = [0, 156], sizes = [4, 264], strides = [1, 1]} : vector<4x512xf32> to vector<4x264xf32>
    %164 = vector.broadcast %25 : vector<4x1xf32> to vector<4x264xf32>
    %165 = arith.mulf %164, %163 : vector<4x264xf32>
    %166 = arith.addf %162, %165 : vector<4x264xf32>
    %167 = vector.extract_strided_slice %139 {offsets = [0, 172], sizes = [4, 264], strides = [1, 1]} : vector<4x512xf32> to vector<4x264xf32>
    %168 = vector.broadcast %27 : vector<4x1xf32> to vector<4x264xf32>
    %169 = arith.mulf %168, %167 : vector<4x264xf32>
    %170 = arith.addf %166, %169 : vector<4x264xf32>
    %171 = vector.extract_strided_slice %139 {offsets = [0, 188], sizes = [4, 264], strides = [1, 1]} : vector<4x512xf32> to vector<4x264xf32>
    %172 = vector.broadcast %29 : vector<4x1xf32> to vector<4x264xf32>
    %173 = arith.mulf %172, %171 : vector<4x264xf32>
    %174 = arith.addf %170, %173 : vector<4x264xf32>
    %175 = vector.broadcast %65 : vector<4x1xf32> to vector<4x264xf32>
    %176 = arith.addf %174, %175 : vector<4x264xf32>
    %177 = vector.extract_strided_slice %176 {offsets = [0, 0], sizes = [4, 256], strides = [1, 1]} : vector<4x264xf32> to vector<4x256xf32>
    %cst_110 = arith.constant 0.000000e+00 : f32
    %178 = vector.shape_cast %75 : vector<1x256xi1> to vector<1x256xi1>
    %179 = vector.broadcast %178 : vector<1x256xi1> to vector<4x256xi1>
    %180 = vector.broadcast %cst_110 : f32 to vector<4x256xf32>
    %181 = arith.select %179, %177, %180 : vector<4x256xi1>, vector<4x256xf32>
    %182 = vector.broadcast %31 : vector<4x1xf32> to vector<4x256xf32>
    %183 = arith.mulf %182, %181 : vector<4x256xf32>
    %184 = vector.extract_strided_slice %176 {offsets = [0, 1], sizes = [4, 256], strides = [1, 1]} : vector<4x264xf32> to vector<4x256xf32>
    %cst_111 = arith.constant 0.000000e+00 : f32
    %185 = vector.shape_cast %80 : vector<1x256xi1> to vector<1x256xi1>
    %186 = vector.broadcast %185 : vector<1x256xi1> to vector<4x256xi1>
    %187 = vector.broadcast %cst_111 : f32 to vector<4x256xf32>
    %188 = arith.select %186, %184, %187 : vector<4x256xi1>, vector<4x256xf32>
    %189 = vector.broadcast %33 : vector<4x1xf32> to vector<4x256xf32>
    %190 = arith.mulf %189, %188 : vector<4x256xf32>
    %191 = arith.addf %183, %190 : vector<4x256xf32>
    %192 = vector.extract_strided_slice %176 {offsets = [0, 2], sizes = [4, 256], strides = [1, 1]} : vector<4x264xf32> to vector<4x256xf32>
    %cst_112 = arith.constant 0.000000e+00 : f32
    %193 = vector.shape_cast %85 : vector<1x256xi1> to vector<1x256xi1>
    %194 = vector.broadcast %193 : vector<1x256xi1> to vector<4x256xi1>
    %195 = vector.broadcast %cst_112 : f32 to vector<4x256xf32>
    %196 = arith.select %194, %192, %195 : vector<4x256xi1>, vector<4x256xf32>
    %197 = vector.broadcast %35 : vector<4x1xf32> to vector<4x256xf32>
    %198 = arith.mulf %197, %196 : vector<4x256xf32>
    %199 = arith.addf %191, %198 : vector<4x256xf32>
    %200 = vector.extract_strided_slice %176 {offsets = [0, 3], sizes = [4, 256], strides = [1, 1]} : vector<4x264xf32> to vector<4x256xf32>
    %cst_113 = arith.constant 0.000000e+00 : f32
    %201 = vector.shape_cast %90 : vector<1x256xi1> to vector<1x256xi1>
    %202 = vector.broadcast %201 : vector<1x256xi1> to vector<4x256xi1>
    %203 = vector.broadcast %cst_113 : f32 to vector<4x256xf32>
    %204 = arith.select %202, %200, %203 : vector<4x256xi1>, vector<4x256xf32>
    %205 = vector.broadcast %37 : vector<4x1xf32> to vector<4x256xf32>
    %206 = arith.mulf %205, %204 : vector<4x256xf32>
    %207 = arith.addf %199, %206 : vector<4x256xf32>
    %208 = vector.extract_strided_slice %176 {offsets = [0, 4], sizes = [4, 256], strides = [1, 1]} : vector<4x264xf32> to vector<4x256xf32>
    %209 = vector.broadcast %39 : vector<4x1xf32> to vector<4x256xf32>
    %210 = arith.mulf %209, %208 : vector<4x256xf32>
    %211 = arith.addf %207, %210 : vector<4x256xf32>
    %212 = vector.extract_strided_slice %176 {offsets = [0, 5], sizes = [4, 256], strides = [1, 1]} : vector<4x264xf32> to vector<4x256xf32>
    %cst_114 = arith.constant 0.000000e+00 : f32
    %213 = vector.shape_cast %95 : vector<1x256xi1> to vector<1x256xi1>
    %214 = vector.broadcast %213 : vector<1x256xi1> to vector<4x256xi1>
    %215 = vector.broadcast %cst_114 : f32 to vector<4x256xf32>
    %216 = arith.select %214, %212, %215 : vector<4x256xi1>, vector<4x256xf32>
    %217 = vector.broadcast %41 : vector<4x1xf32> to vector<4x256xf32>
    %218 = arith.mulf %217, %216 : vector<4x256xf32>
    %219 = arith.addf %211, %218 : vector<4x256xf32>
    %220 = vector.extract_strided_slice %176 {offsets = [0, 6], sizes = [4, 256], strides = [1, 1]} : vector<4x264xf32> to vector<4x256xf32>
    %cst_115 = arith.constant 0.000000e+00 : f32
    %221 = vector.shape_cast %100 : vector<1x256xi1> to vector<1x256xi1>
    %222 = vector.broadcast %221 : vector<1x256xi1> to vector<4x256xi1>
    %223 = vector.broadcast %cst_115 : f32 to vector<4x256xf32>
    %224 = arith.select %222, %220, %223 : vector<4x256xi1>, vector<4x256xf32>
    %225 = vector.broadcast %43 : vector<4x1xf32> to vector<4x256xf32>
    %226 = arith.mulf %225, %224 : vector<4x256xf32>
    %227 = arith.addf %219, %226 : vector<4x256xf32>
    %228 = vector.extract_strided_slice %176 {offsets = [0, 7], sizes = [4, 256], strides = [1, 1]} : vector<4x264xf32> to vector<4x256xf32>
    %cst_116 = arith.constant 0.000000e+00 : f32
    %229 = vector.shape_cast %105 : vector<1x256xi1> to vector<1x256xi1>
    %230 = vector.broadcast %229 : vector<1x256xi1> to vector<4x256xi1>
    %231 = vector.broadcast %cst_116 : f32 to vector<4x256xf32>
    %232 = arith.select %230, %228, %231 : vector<4x256xi1>, vector<4x256xf32>
    %233 = vector.broadcast %45 : vector<4x1xf32> to vector<4x256xf32>
    %234 = arith.mulf %233, %232 : vector<4x256xf32>
    %235 = arith.addf %227, %234 : vector<4x256xf32>
    %236 = vector.extract_strided_slice %176 {offsets = [0, 8], sizes = [4, 256], strides = [1, 1]} : vector<4x264xf32> to vector<4x256xf32>
    %cst_117 = arith.constant 0.000000e+00 : f32
    %237 = vector.shape_cast %110 : vector<1x256xi1> to vector<1x256xi1>
    %238 = vector.broadcast %237 : vector<1x256xi1> to vector<4x256xi1>
    %239 = vector.broadcast %cst_117 : f32 to vector<4x256xf32>
    %240 = arith.select %238, %236, %239 : vector<4x256xi1>, vector<4x256xf32>
    %241 = vector.broadcast %47 : vector<4x1xf32> to vector<4x256xf32>
    %242 = arith.mulf %241, %240 : vector<4x256xf32>
    %243 = arith.addf %235, %242 : vector<4x256xf32>
    %244 = vector.broadcast %66 : vector<4x1xf32> to vector<4x256xf32>
    %245 = arith.addf %243, %244 : vector<4x256xf32>
    %cst_118 = arith.constant 0.000000e+00 : f32
    %246 = vector.broadcast %cst_118 : f32 to vector<4x256xf32>
    %247 = arith.maximumf %245, %246 : vector<4x256xf32>
    %c0_119 = arith.constant 0 : index
    %c128_120 = arith.constant 128 : index
    %248 = vector.load %arg11[%c0_119, %c128_120] : memref<4x512xf32, #tpu.memory_space<vmem>>, vector<4x256xf32>
    tpu.vector_store %arg11[%c0_119, %c128_120], %247 {strides = array<i32>} : memref<4x512xf32, #tpu.memory_space<vmem>>, vector<4x256xf32>,
    %249 = vector.broadcast %49 : vector<8x1xf32> to vector<8x256xf32>
    %250 = vector.broadcast %112 : vector<1x256xf32> to vector<8x256xf32>
    %251 = arith.mulf %249, %250 : vector<8x256xf32>
    %252 = vector.broadcast %51 : vector<8x1xf32> to vector<8x256xf32>
    %253 = vector.broadcast %114 : vector<1x256xf32> to vector<8x256xf32>
    %254 = arith.mulf %252, %253 : vector<8x256xf32>
    %255 = arith.addf %251, %254 : vector<8x256xf32>
    %256 = vector.broadcast %53 : vector<8x1xf32> to vector<8x256xf32>
    %257 = vector.broadcast %116 : vector<1x256xf32> to vector<8x256xf32>
    %258 = arith.mulf %256, %257 : vector<8x256xf32>
    %259 = arith.addf %255, %258 : vector<8x256xf32>
    %260 = vector.broadcast %55 : vector<8x1xf32> to vector<8x256xf32>
    %261 = vector.broadcast %118 : vector<1x256xf32> to vector<8x256xf32>
    %262 = arith.mulf %260, %261 : vector<8x256xf32>
    %263 = arith.addf %259, %262 : vector<8x256xf32>
    %c0_121 = arith.constant 0 : index
    %c128_122 = arith.constant 128 : index
    %264 = vector.load %arg11[%c0_121, %c128_122] : memref<4x512xf32, #tpu.memory_space<vmem>>, vector<1x256xf32>
    %265 = vector.broadcast %57 : vector<8x1xf32> to vector<8x256xf32>
    %266 = vector.broadcast %264 : vector<1x256xf32> to vector<8x256xf32>
    %267 = arith.mulf %265, %266 : vector<8x256xf32>
    %268 = arith.addf %263, %267 : vector<8x256xf32>
    %c1_123 = arith.constant 1 : index
    %c128_124 = arith.constant 128 : index
    %269 = vector.load %arg11[%c1_123, %c128_124] : memref<4x512xf32, #tpu.memory_space<vmem>>, vector<1x256xf32>
    %270 = vector.broadcast %59 : vector<8x1xf32> to vector<8x256xf32>
    %271 = vector.broadcast %269 : vector<1x256xf32> to vector<8x256xf32>
    %272 = arith.mulf %270, %271 : vector<8x256xf32>
    %273 = arith.addf %268, %272 : vector<8x256xf32>
    %c2_125 = arith.constant 2 : index
    %c128_126 = arith.constant 128 : index
    %274 = vector.load %arg11[%c2_125, %c128_126] : memref<4x512xf32, #tpu.memory_space<vmem>>, vector<1x256xf32>
    %275 = vector.broadcast %61 : vector<8x1xf32> to vector<8x256xf32>
    %276 = vector.broadcast %274 : vector<1x256xf32> to vector<8x256xf32>
    %277 = arith.mulf %275, %276 : vector<8x256xf32>
    %278 = arith.addf %273, %277 : vector<8x256xf32>
    %c3_127 = arith.constant 3 : index
    %c128_128 = arith.constant 128 : index
    %279 = vector.load %arg11[%c3_127, %c128_128] : memref<4x512xf32, #tpu.memory_space<vmem>>, vector<1x256xf32>
    %280 = vector.broadcast %63 : vector<8x1xf32> to vector<8x256xf32>
    %281 = vector.broadcast %279 : vector<1x256xf32> to vector<8x256xf32>
    %282 = arith.mulf %280, %281 : vector<8x256xf32>
    %283 = arith.addf %278, %282 : vector<8x256xf32>
    %284 = vector.broadcast %67 : vector<8x1xf32> to vector<8x256xf32>
    %285 = arith.addf %283, %284 : vector<8x256xf32>
    %cst_129 = arith.constant 0.000000e+00 : f32
    %286 = vector.broadcast %cst_129 : f32 to vector<8x256xf32>
    %287 = arith.maximumf %285, %286 : vector<8x256xf32>
    %c0_130 = arith.constant 0 : index
    %c0_131 = arith.constant 0 : index
    %c0_132 = arith.constant 0 : index
    %288 = vector.load %arg10[%c0_130, %c0_131, %c0_132] : memref<1x8x256xf32, #tpu.memory_space<vmem>>, vector<1x8x256xf32>
    %289 = vector.shape_cast %288 : vector<1x8x256xf32> to vector<8x256xf32>
    %290 = vector.shape_cast %287 : vector<8x256xf32> to vector<1x8x256xf32>
    tpu.vector_store %arg10[%c0_130, %c0_131, %c0_132], %290 {strides = array<i32>} : memref<1x8x256xf32, #tpu.memory_space<vmem>>, vector<1x8x256xf32>,
    return
  }
  func.func @transform_0(%arg0: i32) -> (i32, i32, i32) {
    %c0_i32 = arith.constant 0 : i32
    %c0_i32_0 = arith.constant 0 : i32
    %c0_i32_1 = arith.constant 0 : i32
    return %arg0, %c0_i32, %c0_i32_0 : i32, i32, i32
  }
  func.func @transform_1(%arg0: i32) -> (i32, i32, i32) {
    %c0_i32 = arith.constant 0 : i32
    %c0_i32_0 = arith.constant 0 : i32
    %c0_i32_1 = arith.constant 0 : i32
    %c0_i32_2 = arith.constant 0 : i32
    return %c0_i32, %c0_i32_0, %c0_i32_1 : i32, i32, i32
  }
  func.func @transform_2(%arg0: i32) -> (i32, i32) {
    %c0_i32 = arith.constant 0 : i32
    %c0_i32_0 = arith.constant 0 : i32
    %c0_i32_1 = arith.constant 0 : i32
    return %c0_i32, %c0_i32_0 : i32, i32
  }
  func.func @transform_3(%arg0: i32) -> (i32, i32, i32) {
    %c0_i32 = arith.constant 0 : i32
    %c0_i32_0 = arith.constant 0 : i32
    %c0_i32_1 = arith.constant 0 : i32
    %c0_i32_2 = arith.constant 0 : i32
    return %c0_i32, %c0_i32_0, %c0_i32_1 : i32, i32, i32
  }
  func.func @transform_4(%arg0: i32) -> (i32, i32) {
    %c0_i32 = arith.constant 0 : i32
    %c0_i32_0 = arith.constant 0 : i32
    %c0_i32_1 = arith.constant 0 : i32
    return %c0_i32, %c0_i32_0 : i32, i32
  }
  func.func @transform_5(%arg0: i32) -> (i32, i32, i32) {
    %c0_i32 = arith.constant 0 : i32
    %c0_i32_0 = arith.constant 0 : i32
    %c0_i32_1 = arith.constant 0 : i32
    %c0_i32_2 = arith.constant 0 : i32
    return %c0_i32, %c0_i32_0, %c0_i32_1 : i32, i32, i32
  }
  func.func @transform_6(%arg0: i32) -> (i32, i32) {
    %c0_i32 = arith.constant 0 : i32
    %c0_i32_0 = arith.constant 0 : i32
    %c0_i32_1 = arith.constant 0 : i32
    return %c0_i32, %c0_i32_0 : i32, i32
  }
  func.func @transform_7(%arg0: i32) -> (i32, i32, i32) {
    %c0_i32 = arith.constant 0 : i32
    %c0_i32_0 = arith.constant 0 : i32
    %c0_i32_1 = arith.constant 0 : i32
    %c0_i32_2 = arith.constant 0 : i32
    return %c0_i32, %c0_i32_0, %c0_i32_1 : i32, i32, i32
  }
  func.func @transform_8(%arg0: i32) -> (i32, i32) {
    %c0_i32 = arith.constant 0 : i32
    %c0_i32_0 = arith.constant 0 : i32
    %c0_i32_1 = arith.constant 0 : i32
    return %c0_i32, %c0_i32_0 : i32, i32
  }
  func.func @transform_9(%arg0: i32) -> (i32, i32, i32) {
    %c0_i32 = arith.constant 0 : i32
    %c0_i32_0 = arith.constant 0 : i32
    %c0_i32_1 = arith.constant 0 : i32
    return %arg0, %c0_i32, %c0_i32_0 : i32, i32, i32
  }
}

</mosaic_0001>

<bundles_post_ra>
// kernel: tpu_custom_call.1
= control target key start
LH: loop header
LB: loop body
LE: loop exit
PB: predicated region body
PF: predicated region fallthrough
CT: control target
= control target key end

     0   :  { %14 = vsyncpa [#allocation4], 0  ;;  %s1854_s0 = inlined_call_operand.vmem [shape: f32[2,4,256], index: 0, kind: input, shape index: {}]   ;;  %s1855_s1 = inlined_call_operand.vmem [shape: f32[4,4,1], index: 1, kind: input, shape index: {}]   ;;  %s1856_s2 = inlined_call_operand.vmem [shape: f32[4,1], index: 2, kind: input, shape index: {}]   ;;  %s1857_s3 = inlined_call_operand.vmem [shape: f32[9,4,1], index: 3, kind: input, shape index: {}]   ;;  %s1858_s4 = inlined_call_operand.vmem [shape: f32[4,1], index: 4, kind: input, shape index: {}]   ;;  %s1859_s5 = inlined_call_operand.vmem [shape: f32[9,4,1], index: 5, kind: input, shape index: {}]   ;;  %s1860_s6 = inlined_call_operand.vmem [shape: f32[4,1], index: 6, kind: input, shape index: {}]   ;;  %s1861_s7 = inlined_call_operand.vmem [shape: f32[8,8,1], index: 7, kind: input, shape index: {}]   ;;  %s1862_s8 = inlined_call_operand.vmem [shape: f32[8,1], index: 8, kind: input, shape index: {}]   ;;  %s1863_s9 = inlined_call_operand.hbm [shape: f32[2,8,256], index: 9, kind: output, shape index: {}]  }
   0x1   :  { %16 = vsyncpa [#allocation4 + $0x1], 0  ;;  %s1439_s30 = smov 0   ;;  %s1441_s10 = smov 0  }
   0x2   :  { %s1443_s11 = smov 0   ;;  %s1445_s12 = smov 0  }
   0x3 LB: > { %s1460_s13 = sadd.s32 4294967295, %s1368_s12   ;;  %s1202_s14 = sadd.s32 4294967294, %s1368_s12   ;;  %s1368_s12 = sphi %s1445_s12, %s1869_s12   ;;  %s1364_s11 = sphi %s1443_s11, %s1868_s11   ;;  %s1360_s10 = sphi %s1441_s10, %s1867_s10   ;;  %s1356_s30 = sphi %s1439_s30, %s1866_s30  }
   0x4   : > { %s1464_s15 = sadd.s32 1, %s1368_s12   ;;  %s223_s16 = sadd.s32 1, %s1364_s11 }
   0x5   : > { %s220_s17 = ssub.s32 %s1368_s12, %s1464_s15  ;;  %p233_p0 = scmp.ne.s32.totalorder %s1364_s11, %s1360_s10 }
   0x6   : > { %p221_p1 = scmp.eq.s32.totalorder %s220_s17, 0  ;;  %p234_p2 = scmp.eq.s32.totalorder %s1460_s13, 1 }
   0x7   : > { %p239_p3 = scmp.ne.s32.totalorder %s1360_s10, %s1356_s30  ;;  %p240_p4 = scmp.eq.s32.totalorder %s1202_s14, 1 }
   0x8   : > { %s1475_s18 = scalar_select %p221_p1, %s1364_s11, %s223_s16  }
   0x9   : > { %p1477_p5 = por %p234_p2, %p233_p0  ;;  %p1481_p6 = por %p240_p4, %p239_p3 }
   0xa   : > { %p1205_p7 = scmp.ge.s32.totalorder %s1368_s12, 1  ;;  %p290_p8 = scmp.lt.s32.totalorder %s1368_s12, 3 }
   0xc   : > { %p291_p9 = pnand %p1205_p7, %p290_p8 }
   0xd   : > { %v1210_v0 = vld [vmem:[%s1855_s1 + $0x8] sm:$0xf] (!%p291_p9)  ;;  %v333_v1 = vld [vmem:[%s1855_s1] sm:$0xf] (!%p291_p9)  ;;  %v1370_v2 = vmov (!%p291_p9), 0   ;;  %v1371_v13 = vmov (!%p291_p9), 0.0   ;;  %v393_v16 = vlaneseq (!%p291_p9) }
   0xe   : > { %294 = sbr.rel (%p291_p9) target bundleno = 576 (0x240), region = 56  ;;  %1303 = vset.pattern.permute.xlu1 (!%p291_p9), %v1370_v2  ;;  %1302 = vset.pattern.permute.xlu0 (!%p291_p9), %v1370_v2  ;;  %v1211_v3 = vld [vmem:[%s1855_s1 + $0xc] sm:$0xf] (!%p291_p9)  ;;  %v1209_v4 = vld [vmem:[%s1855_s1 + $0x4] sm:$0xf] (!%p291_p9)  ;;  %p326_p10 = scmp.lt.s32.totalorder (!%p291_p9), %s1460_s13, 1 }
   0xf   : > { %493 = vperm.xlu1 (!%p291_p9), %1303, %v1210_v0   ;;  %455 = vperm.xlu0 (!%p291_p9), %1302, %v333_v1   ;;  %v340_v5 = vld [vmem:[%s1857_s3] sm:$0xf] (!%p291_p9)  ;;  %v1212_v7 = vld [vmem:[%s1857_s3 + $0x4] sm:$0xf] (!%p291_p9)  ;;  %v1215_v8 = vld [vmem:[%s1857_s3 + $0x10] sm:$0xf] (!%p291_p9) }
  0x10   : > { %v389_v6 = vld [vmem:[%s1856_s2] sm:$0xf] (!%p291_p9)  ;;  %v1213_v9 = vld [vmem:[%s1857_s3 + $0x8] sm:$0xf] (!%p291_p9)  ;;  %v1218_v10 = vld [vmem:[%s1857_s3 + $0x1c] sm:$0xf] (!%p291_p9) }
  0x11   : > { %v1214_v11 = vld [vmem:[%s1857_s3 + $0xc] sm:$0xf] (!%p291_p9)  ;;  %v1219_v12 = vld [vmem:[%s1857_s3 + $0x20] sm:$0xf] (!%p291_p9)  ;;  %332 = vst [vmem:[#allocation2 + $0xc] sm:$0xf] (!%p291_p9), %v1371_v13 }
  0x12   : > { %331 = vst [vmem:[#allocation2] sm:$0xf] (!%p291_p9), %v1371_v13  ;;  %v1216_v14 = vld [vmem:[%s1857_s3 + $0x14] sm:$0xf] (!%p291_p9)  ;;  %v1217_v15 = vld [vmem:[%s1857_s3 + $0x18] sm:$0xf] (!%p291_p9) }
  0x13   : > { %513 = vperm.xlu1 (!%p291_p9), %1303, %v1211_v3   ;;  %473 = vperm.xlu0 (!%p291_p9), %1302, %v1209_v4   ;;  %v460_v17 = vshrl.u32 (!%p291_p9), %v393_v16, 7  ;;  %s1372_s14 = smov (!%p291_p9), 84   ;;  %s1373_s16 = smov (!%p291_p9), 68   ;;  %v390_v60 = vld [vmem:[%s1858_s4] sm:$0xf] (!%p291_p9)  ;;  %vm581_vm0 = vcmask (!%p291_p9), 424960  }
  0x14   : > { %s1374_s17 = smov (!%p291_p9), 52   ;;  %s1375_s21 = smov (!%p291_p9), 36   ;;  %v1223_v61 = vld [vmem:[%s1859_s5 + $0x10] sm:$0xf] (!%p291_p9)  ;;  %v1221_v62 = vld [vmem:[%s1859_s5 + $0x8] sm:$0xf] (!%p291_p9) }
  0x15   : > { %s327_s25 = scalar_select %p326_p10, %s1460_s13, 1  ;;  %v1535_v18 = vsub.s32 0, %v460_v17  ;;  %v1537_v19 = vsub.s32 1, %v460_v17  ;;  %v1226_v63 = vld [vmem:[%s1859_s5 + $0x1c] sm:$0xf]  ;;  %vm561_vm1 = vcmask 556032  }
  0x16   : > { %s1376_s22 = smov 20   ;;  %s1377_s23 = smov 4   ;;  %v357_v0 = vld [vmem:[%s1859_s5] sm:$0xf]  ;;  %v1220_v1 = vld [vmem:[%s1859_s5 + $0x4] sm:$0xf] }
  0x17   : > { %549 = vperm.xlu1 %1303, %v340_v5   ;;  %533 = vperm.xlu0 %1302, %v389_v6   ;;  %s1243_s26 = sshll.u32 %s327_s25, 3  ;;  %s1378_s24 = smov 116   ;;  %v1222_v2 = vld [vmem:[%s1859_s5 + $0xc] sm:$0xf]  ;;  %v1224_v3 = vld [vmem:[%s1859_s5 + $0x14] sm:$0xf] }
  0x18   : > { %s330_s29 = scalar_lea.vmem %s1854_s0, %s1243_s26  ;;  %s1379_s25 = smov 100   ;;  %v1225_v4 = vld [vmem:[%s1859_s5 + $0x18] sm:$0xf]  ;;  %v1227_v5 = vld [vmem:[%s1859_s5 + $0x20] sm:$0xf]  ;;  %vm604_vm2 = vcmask 293888  }
  0x19   : > { %v446_v20 = vld [vmem:[%s330_s29] ss:$4 sm:$0x3]  ;;  %v1235_v21 = vld [vmem:[%s330_s29 + $0x1] ss:$4 sm:$0x3] }
  0x1a   : > { %v1236_v23 = vld [vmem:[%s330_s29 + $0x2] ss:$4 sm:$0x3]  ;;  %v1540_v25 = vrot.slane %v446_v20, %v1535_v18  ;;  %v1543_v26 = vrot.slane %v446_v20, %v1537_v19  ;;  %v1237_v27 = vld [vmem:[%s330_s29 + $0x3] ss:$4 sm:$0x3]  ;;  %v1546_v28 = vrot.slane %v1235_v21, %v1535_v18  ;;  %v1549_v29 = vrot.slane %v1235_v21, %v1537_v19 }
  0x1b   : > { %572 = vperm.xlu1 %1303, %v1212_v7   ;;  %641 = vperm.xlu0 %1302, %v1215_v8   ;;  %v1552_v30 = vrot.slane %v1236_v23, %v1535_v18  ;;  %v1555_v31 = vrot.slane %v1236_v23, %v1537_v19  ;;  %v1558_v32 = vrot.slane %v1237_v27, %v1535_v18  ;;  %vm627_vm3 = vcmask 162816   ;;  %s1382_s26 = smov 125   ;;  %s1383_s27 = smov 123  }
  0x1c   : > { %v1561_v33 = vrot.slane %v1237_v27, %v1537_v19  ;;  %vm653_vm4 = vcmask 31744   ;;  %vm677_vm5 = vcmask 949248   ;;  %vm700_vm6 = vcmask 818176   ;;  %s1384_s28 = smov 122   ;;  %s1386_s29 = smov 124  }
  0x1d   : > { %vm723_vm7 = vcmask 687104   ;;  %vm785_vm8 = vcmask 1039360   ;;  %vm811_vm11 = vcmask 1031168  }
  0x1f   : > { %595 = vperm.xlu1 %1303, %v1213_v9   ;;  %714 = vperm.xlu0 %1302, %v1218_v10  }
  0x23   : > { %618 = vperm.xlu1 %1303, %v1214_v11   ;;  %737 = vperm.xlu0 %1302, %v1219_v12  }
  0x27   : > { %668 = vperm.xlu1 %1303, %v1216_v14  }
  0x2b   : > { %691 = vperm.xlu1 %1303, %v1217_v15  }
  0x8e   : > { %v494_v22 = vpop.permute.xlu1 %493  ;;  %v456_v24 = vpop.permute.xlu0 %455 }
  0x8f   : > { %v469_v35 = vmul.f32 %v1540_v25, %v456_v24  ;;  %v470_v36 = vmul.f32 %v1543_v26, %v456_v24  ;;  %v507_v40 = vmul.f32 %v1552_v30, %v494_v22  ;;  %v508_v41 = vmul.f32 %v1555_v31, %v494_v22 }
  0x92   : > { %v474_v34 = vpop.permute.xlu0 %473  ;;  %v514_v39 = vpop.permute.xlu1 %513 }
  0x93   : > { %v487_v37 = vmul.f32 %v1546_v28, %v474_v34  ;;  %v488_v38 = vmul.f32 %v1549_v29, %v474_v34  ;;  %v527_v44 = vmul.f32 %v1558_v32, %v514_v39  ;;  %v528_v45 = vmul.f32 %v1561_v33, %v514_v39 }
  0x95   : > { %v489_v42 = vadd.f32 %v487_v37, %v469_v35  ;;  %v490_v43 = vadd.f32 %v488_v38, %v470_v36 }
  0x96   : > { %v534_v50 = vpop.permute.xlu0 %533  ;;  %v1608_v6 = vpop.permute.xlu1 %549 }
  0x97   : > { %v509_v46 = vadd.f32 %v507_v40, %v489_v42  ;;  %v510_v47 = vadd.f32 %v508_v41, %v490_v43 }
  0x99   : > { %v529_v48 = vadd.f32 %v527_v44, %v509_v46  ;;  %v530_v49 = vadd.f32 %v528_v45, %v510_v47 }
  0x9a   : > { %v1610_v7 = vpop.permute.xlu1 %572  ;;  %v1614_v9 = vpop.permute.xlu0 %641 }
  0x9b   : > { %v536_v51 = vadd.f32 %v534_v50, %v529_v48  ;;  %v537_v52 = vadd.f32 %v534_v50, %v530_v49 }
  0x9d   : > { %v538_v53 = vmax.f32 %v536_v51, 0.0  ;;  %v539_v54 = vmax.f32 %v537_v52, 0.0 }
  0x9e   : > { %v1612_v8 = vpop.permute.xlu1 %595  ;;  %v1618_v11 = vpop.permute.xlu0 %714 }
  0x9f   : > { %v542_v55 = vcombine.low %v538_v53, %v539_v54 }
  0xa1   : > { %544 = vst [vmem:[#allocation2 + $0x4] sm:$0xff] %v542_v55 }
  0xa2   : > { %v1616_v10 = vpop.permute.xlu1 %618  ;;  %v1622_v13 = vpop.permute.xlu0 %737 }
  0xa6   : > { %v1620_v12 = vpop.permute.xlu1 %668 }
  0xa8   : > { %v546_v56 = vld [vmem:[#allocation2 + $0x8] sm:$0xff]  ;;  %v545_v57 = vld [vmem:[#allocation2] sm:$0xff] }
  0xa9   : > { %719 = vrot.lane.b32.xlu1 %v546_v56, %s1372_s14  ;;  %555 = vrot.lane.b32.xlu0 %v545_v57, %s1373_s16  ;;  %v554_v58 = vcombine.high %v545_v57, %v545_v57  ;;  %v644_v59 = vcombine.high %v546_v56, %v546_v56 }
  0xaa   : > { %v1624_v14 = vpop.permute.xlu1 %691 }
  0xad   : > { %559 = vrot.lane.b32.xlu0 %v546_v56, %s1373_s16  ;;  %557 = vrot.lane.b32.xlu1 %v554_v58, %s1373_s16 }
  0xb1   : > { %575 = vrot.lane.b32.xlu0 %v545_v57, %s1374_s17  ;;  %577 = vrot.lane.b32.xlu1 %v554_v58, %s1374_s17 }
  0xb5   : > { %579 = vrot.lane.b32.xlu0 %v546_v56, %s1374_s17  ;;  %600 = vrot.lane.b32.xlu1 %v554_v58, %s1375_s21  ;;  %s1387_s17 = smov 120  }
  0xb9   : > { %598 = vrot.lane.b32.xlu0 %v545_v57, %s1375_s21  ;;  %623 = vrot.lane.b32.xlu1 %v554_v58, %s1376_s22 }
  0xbd   : > { %602 = vrot.lane.b32.xlu0 %v546_v56, %s1375_s21  ;;  %647 = vrot.lane.b32.xlu1 %v554_v58, %s1377_s23 }
  0xc1   : > { %621 = vrot.lane.b32.xlu0 %v545_v57, %s1376_s22  ;;  %651 = vrot.lane.b32.xlu1 %v644_v59, %s1377_s23 }
  0xc5   : > { %625 = vrot.lane.b32.xlu0 %v546_v56, %s1376_s22  ;;  %671 = vrot.lane.b32.xlu1 %v554_v58, %s1378_s24 }
  0xc9   : > { %645 = vrot.lane.b32.xlu0 %v545_v57, %s1377_s23  ;;  %675 = vrot.lane.b32.xlu1 %v644_v59, %s1378_s24 }
  0xcd   : > { %649 = vrot.lane.b32.xlu0 %v546_v56, %s1377_s23  ;;  %694 = vrot.lane.b32.xlu1 %v554_v58, %s1379_s25 }
  0xd1   : > { %673 = vrot.lane.b32.xlu0 %v546_v56, %s1378_s24  ;;  %698 = vrot.lane.b32.xlu1 %v644_v59, %s1379_s25  ;;  %s1380_s24 = smov 126  }
  0xd5   : > { %696 = vrot.lane.b32.xlu0 %v546_v56, %s1379_s25  ;;  %753 = vperm.xlu1 %1303, %v390_v60   ;;  %s1381_s25 = smov 127  }
  0xd9   : > { %717 = vrot.lane.b32.xlu0 %v554_v58, %s1372_s14  ;;  %855 = vperm.xlu1 %1303, %v1223_v61  }
  0xdd   : > { %721 = vrot.lane.b32.xlu0 %v644_v59, %s1372_s14  ;;  %820 = vperm.xlu1 %1303, %v1221_v62   ;;  %s1385_s14 = smov 121  }
  0xe1   : > { %740 = vrot.lane.b32.xlu0 %v644_v59, %s1373_s16  ;;  %948 = vperm.xlu1 %1303, %v1226_v63  }
  0xe5   : > { %767 = vperm.xlu0 %1302, %v357_v0  }
  0xe9   : > { %794 = vperm.xlu0 %1302, %v1220_v1  }
  0xed   : > { %846 = vperm.xlu0 %1302, %v1222_v2  }
  0xf1   : > { %896 = vperm.xlu0 %1302, %v1224_v3  }
  0xf5   : > { %922 = vperm.xlu0 %1302, %v1225_v4  }
  0xf9   : > { %974 = vperm.xlu0 %1302, %v1227_v5  }
 0x11b   : > { %v1626_v15 = vpop.permute.xlu1 %719  ;;  %v556_v17 = vpop.permute.xlu0 %555 }
 0x11f   : > { %v1628_v20 = vpop.permute.xlu0 %559  ;;  %v558_v21 = vpop.permute.xlu1 %557 }
 0x120   : > { %v562_v35 = vsel %vm561_vm1, %v556_v17, %v558_v21  ;;  %v569_v55 = vmul.f32 %v1628_v20, %v1608_v6 }
 0x121   : > { %v567_v37 = vmul.f32 %v562_v35, %v1608_v6 }
 0x123   : > { %v576_v22 = vpop.permute.xlu0 %575  ;;  %v578_v23 = vpop.permute.xlu1 %577 }
 0x124   : > { %v582_v24 = vsel %vm581_vm0, %v576_v22, %v578_v23 }
 0x125   : > { %v587_v36 = vmul.f32 %v582_v24, %v1610_v7 }
 0x127   : > { %v580_v27 = vpop.permute.xlu0 %579  ;;  %v601_v34 = vpop.permute.xlu1 %600  ;;  %v590_v41 = vadd.f32 %v587_v36, %v567_v37 }
 0x128   : > { %v589_v53 = vmul.f32 %v580_v27, %v1610_v7 }
 0x12a   : > { %v592_v61 = vadd.f32 %v589_v53, %v569_v55 }
 0x12b   : > { %v599_v38 = vpop.permute.xlu0 %598  ;;  %v624_v39 = vpop.permute.xlu1 %623 }
 0x12c   : > { %v605_v40 = vsel %vm604_vm2, %v599_v38, %v601_v34  ;;  %v583_v38 = vsel %vm581_vm0, %v578_v23, %v580_v27  ;;  %vm837_vm0 = vcmask 1022976  }
 0x12d   : > { %v610_v42 = vmul.f32 %v605_v40, %v1612_v8 }
 0x12f   : > { %v613_v43 = vadd.f32 %v610_v42, %v590_v41  ;;  %v603_v44 = vpop.permute.xlu0 %602  ;;  %v648_v45 = vpop.permute.xlu1 %647 }
 0x130   : > { %v612_v56 = vmul.f32 %v603_v44, %v1612_v8 }
 0x132   : > { %v615_v2 = vadd.f32 %v612_v56, %v592_v61 }
 0x133   : > { %v622_v46 = vpop.permute.xlu0 %621  ;;  %v652_v47 = vpop.permute.xlu1 %651 }
 0x134   : > { %v628_v54 = vsel %vm627_vm3, %v622_v46, %v624_v39  ;;  %v563_v46 = vsel %vm561_vm1, %v558_v21, %v1628_v20 }
 0x135   : > { %v633_v58 = vmul.f32 %v628_v54, %v1616_v10  ;;  %v588_v54 = vmul.f32 %v583_v38, %v1610_v7  ;;  %v745_v27 = vmul.f32 %v1622_v13, %v563_v46 }
 0x137   : > { %v626_v48 = vpop.permute.xlu0 %625  ;;  %v672_v49 = vpop.permute.xlu1 %671  ;;  %v636_v4 = vadd.f32 %v633_v58, %v613_v43  ;;  %v568_v58 = vmul.f32 %v563_v46, %v1608_v6  ;;  %v1234_v46 = vld [vmem:[%s1861_s7 + $0x38] sm:$0xff] }
 0x138   : > { %v635_v62 = vmul.f32 %v626_v48, %v1616_v10  ;;  %v629_v56 = vsel %vm627_vm3, %v624_v39, %v626_v48  ;;  %vm887_vm3 = vcmask 1006592  }
 0x139   : > { %v634_v7 = vmul.f32 %v629_v56, %v1616_v10 }
 0x13a   : > { %v638_v22 = vadd.f32 %v635_v62, %v615_v2  ;;  %v591_v62 = vadd.f32 %v588_v54, %v568_v58 }
 0x13b   : > { %v646_v50 = vpop.permute.xlu0 %645  ;;  %v676_v51 = vpop.permute.xlu1 %675 }
 0x13c   : > { %v654_v57 = vsel %vm653_vm4, %v646_v50, %v648_v45  ;;  %v685_v43 = vmul.f32 %v676_v51, %v1620_v12 }
 0x13d   : > { %v660_v0 = vmul.f32 %v654_v57, %v1614_v9 }
 0x13f   : > { %v650_v52 = vpop.permute.xlu0 %649  ;;  %v695_v1 = vpop.permute.xlu1 %694  ;;  %v663_v35 = vadd.f32 %v660_v0, %v636_v4 }
 0x140   : > { %v656_v59 = vsel %vm653_vm4, %v650_v52, %v652_v47 }
 0x141   : > { %v662_v3 = vmul.f32 %v656_v59, %v1614_v9 }
 0x143   : > { %v674_v60 = vpop.permute.xlu0 %673  ;;  %v665_v37 = vadd.f32 %v662_v3, %v638_v22  ;;  %v699_v41 = vpop.permute.xlu1 %698 }
 0x144   : > { %v678_v63 = vsel %vm677_vm5, %v672_v49, %v674_v60  ;;  %v606_v49 = vsel %vm604_vm2, %v601_v34, %v603_v44  ;;  %v708_v23 = vmul.f32 %v699_v41, %v1624_v14  ;;  %v655_v44 = vsel %vm653_vm4, %v648_v45, %v650_v52 }
 0x145   : > { %v683_v5 = vmul.f32 %v678_v63, %v1620_v12  ;;  %v688_v55 = vadd.f32 %v685_v43, %v665_v37  ;;  %v611_v59 = vmul.f32 %v606_v49, %v1612_v8  ;;  %v679_v0 = vsel %vm677_vm5, %v674_v60, %v676_v51  ;;  %v1228_v37 = vld [vmem:[%s1861_s7 + $0x8] sm:$0xff]  ;;  %v374_v43 = vld [vmem:[%s1861_s7] sm:$0xff] }
 0x146   : > { %v661_v39 = vmul.f32 %v655_v44, %v1614_v9  ;;  %v684_v4 = vmul.f32 %v679_v0, %v1620_v12  ;;  %v1231_v49 = vld [vmem:[%s1861_s7 + $0x20] sm:$0xff]  ;;  %vm870_vm4 = vcmask 1014784  }
 0x147   : > { %v697_v17 = vpop.permute.xlu0 %696  ;;  %v686_v40 = vadd.f32 %v683_v5, %v663_v35  ;;  %v711_v63 = vadd.f32 %v708_v23, %v688_v55  ;;  %v614_v2 = vadd.f32 %v611_v59, %v591_v62 }
 0x148   : > { %v701_v24 = vsel %vm700_vm6, %v695_v1, %v697_v17  ;;  %v702_v8 = vsel %vm700_vm6, %v697_v17, %v699_v41  ;;  %v391_v41 = vld [vmem:[%s1860_s6] sm:$0xf] }
 0x149   : > { %v706_v36 = vmul.f32 %v701_v24, %v1624_v14  ;;  %v637_v3 = vadd.f32 %v634_v7, %v614_v2  ;;  %v707_v51 = vmul.f32 %v702_v8, %v1624_v14  ;;  %v394_v8 = vand.u32 127, %v393_v16 }
 0x14b   : > { %v718_v42 = vpop.permute.xlu0 %717  ;;  %v709_v50 = vadd.f32 %v706_v36, %v686_v40  ;;  %v664_v5 = vadd.f32 %v661_v39, %v637_v3  ;;  %v1230_v40 = vld [vmem:[%s1861_s7 + $0x18] sm:$0xff]  ;;  %v395_v3 = vadd.s32 128, %v394_v8 }
 0x14c   : > { %v724_v47 = vsel %vm723_vm7, %v718_v42, %v1626_v15  ;;  %v1232_v42 = vld [vmem:[%s1861_s7 + $0x28] sm:$0xff] }
 0x14d   : > { %v729_v53 = vmul.f32 %v724_v47, %v1618_v11  ;;  %v687_v22 = vadd.f32 %v684_v4, %v664_v5  ;;  %v1229_v47 = vld [vmem:[%s1861_s7 + $0x10] sm:$0xff] }
 0x14f   : > { %v732_v21 = vadd.f32 %v729_v53, %v709_v50  ;;  %v722_v57 = vpop.permute.xlu0 %721  ;;  %v710_v12 = vadd.f32 %v707_v51, %v687_v22  ;;  %v1233_v50 = vld [vmem:[%s1861_s7 + $0x30] sm:$0xff]  ;;  %v392_v53 = vld [vmem:[%s1862_s8] sm:$0xff] }
 0x150   : > { %v731_v34 = vmul.f32 %v722_v57, %v1618_v11  ;;  %v725_v52 = vsel %vm723_vm7, %v1626_v15, %v722_v57  ;;  %vm913_vm7 = vcmask 998400  }
 0x151   : > { %v748_v61 = vadd.f32 %v745_v27, %v732_v21  ;;  %v730_v24 = vmul.f32 %v725_v52, %v1618_v11  ;;  %v1749_v52 = vand.u32 15, %v395_v3 }
 0x152   : > { %v734_v48 = vadd.f32 %v731_v34, %v711_v63 }
 0x153   : > { %v741_v1 = vpop.permute.xlu0 %740  ;;  %v733_v35 = vadd.f32 %v730_v24, %v710_v12  ;;  %vm405_vm9 = vcmp.ge.s32.totalorder %v1749_v52, 3  ;;  %vm399_vm12 = vcmp.ge.s32.totalorder %v1749_v52, 4  ;;  %vm411_vm15 = vcmp.ge.s32.totalorder %v1749_v52, 2 }
 0x154   : > { %v747_v6 = vmul.f32 %v741_v1, %v1622_v13  ;;  %v754_v10 = vpop.permute.xlu1 %753  ;;  %v742_v9 = vsel %vm561_vm1, %v1628_v20, %v741_v1  ;;  %vm417_vm2 = vcmp.ge.s32.totalorder %v1749_v52, 1  ;;  %vm425_vm6 = vcmp.lt.s32.totalorder %v1749_v52, 15 }
 0x155   : > { %v746_v17 = vmul.f32 %v742_v9, %v1622_v13  ;;  %v1683_v36 = vadd.f32 %v754_v10, %v748_v61 }
 0x156   : > { %v750_v45 = vadd.f32 %v747_v6, %v734_v48 }
 0x157   : > { %v749_v14 = vadd.f32 %v746_v17, %v733_v35 }
 0x158   : > { %v758_v60 = vadd.f32 %v754_v10, %v750_v45  ;;  %v856_v15 = vpop.permute.xlu1 %855 }
 0x159   : > { %v1680_v20 = vadd.f32 %v754_v10, %v749_v14  ;;  %v858_v38 = vmul.f32 %v856_v15, %v1683_v36  ;;  %v1751_v10 = vand.u32 15, %v394_v8 }
 0x15a   : > { %809 = vrot.lane.b32.xlu1 %v758_v60, %s1380_s24  ;;  %783 = vrot.lane.b32.xlu0 %v758_v60, %s1381_s25  ;;  %v860_v11 = vmul.f32 %v856_v15, %v758_v60 }
 0x15b   : > { %v859_v13 = vmul.f32 %v856_v15, %v1680_v20  ;;  %vm404_vm10 = vcmp.ge.s32.totalorder %v1751_v10, 3  ;;  %vm410_vm13 = vcmp.ge.s32.totalorder %v1751_v10, 2  ;;  %vm398_vm14 = vcmp.ge.s32.totalorder %v1751_v10, 4 }
 0x15c   : > { %v821_v56 = vpop.permute.xlu1 %820  ;;  %vm416_vm1 = vcmp.ge.s32.totalorder %v1751_v10, 1  ;;  %v764_v15 = vsel %vm399_vm12, %v1680_v20, 0.0  ;;  %vm424_vm5 = vcmp.lt.s32.totalorder %v1751_v10, 15  ;;  %vm436_vm12 = vcmp.lt.s32.totalorder %v1751_v10, 13 }
 0x15e   : > { %835 = vrot.lane.b32.xlu1 %v758_v60, %s1382_s26  ;;  %885 = vrot.lane.b32.xlu0 %v758_v60, %s1383_s27 }
 0x160   : > { %v1736_v57 = vpop.permute.xlu1 %948 }
 0x162   : > { %911 = vrot.lane.b32.xlu1 %v758_v60, %s1384_s28  ;;  %937 = vrot.lane.b32.xlu0 %v758_v60, %s1385_s14 }
 0x164   : > { %v768_v54 = vpop.permute.xlu0 %767 }
 0x166   : > { %807 = vrot.lane.b32.xlu0 %v1680_v20, %s1380_s24  ;;  %868 = vrot.lane.b32.xlu1 %v860_v11, %s1386_s29 }
 0x168   : > { %v795_v55 = vpop.permute.xlu0 %794 }
 0x16a   : > { %833 = vrot.lane.b32.xlu0 %v1680_v20, %s1382_s26  ;;  %779 = vrot.lane.b32.xlu1 %v1683_v36, %s1381_s25 }
 0x16c   : > { %v1730_v23 = vpop.permute.xlu0 %846 }
 0x16e   : > { %881 = vrot.lane.b32.xlu0 %v1683_v36, %s1383_s27  ;;  %781 = vrot.lane.b32.xlu1 %v1680_v20, %s1381_s25  ;;  %s1388_s25 = smov [#allocation3]  }
 0x170   : > { %v1732_v27 = vpop.permute.xlu0 %896 }
 0x172   : > { %909 = vrot.lane.b32.xlu0 %v1680_v20, %s1384_s28  ;;  %805 = vrot.lane.b32.xlu1 %v1683_v36, %s1380_s24 }
 0x174   : > { %v1734_v21 = vpop.permute.xlu0 %922 }
 0x176   : > { %933 = vrot.lane.b32.xlu0 %v1683_v36, %s1385_s14  ;;  %831 = vrot.lane.b32.xlu1 %v1683_v36, %s1382_s26  ;;  %s1310_s26 = sshll.u32 %s1388_s25, 4  ;;  %s1311_s26 = int_to_ptr.vmem [resolvable:$false] %s1310_s26 }
 0x178   : > { %v1738_v58 = vpop.permute.xlu0 %974 }
 0x17a   : > { %883 = vrot.lane.b32.xlu1 %v1680_v20, %s1383_s27  ;;  %866 = vrot.lane.b32.xlu0 %v859_v13, %s1386_s29  ;;  %v771_v13 = vmul.f32 %v768_v54, %v764_v15  ;;  %s1312_s27 = scalar_lea.vmem %s1311_s26, 512 }
 0x17e   : > { %907 = vrot.lane.b32.xlu1 %v1683_v36, %s1384_s28  ;;  %959 = vrot.lane.b32.xlu0 %v1683_v36, %s1387_s17  ;;  %s323_s28 = sand.u32 1, %s1360_s10  }
 0x182   : > { %935 = vrot.lane.b32.xlu1 %v1680_v20, %s1385_s14  ;;  %963 = vrot.lane.b32.xlu0 %v758_v60, %s1387_s17  ;;  %s1206_s14 = sshll.u32 %s323_s28, 4 }
 0x183   : > { %s325_s16 = scalar_lea.vmem [#allocation3], %s1206_s14 }
 0x184   : > { %s1143_s21 = sshll.u32 %s325_s16, 4  ;;  %s1812_s21 = int_to_ptr.vmem [resolvable:$true] %s1143_s21 }
 0x185   : > { %p1313_p0 = scmp.lt.s32.totalorder %s1812_s21, %s1311_s26 }
 0x186   : > { %1004 = vperm.xlu0 %1302, %v1228_v37   ;;  %864 = vrot.lane.b32.xlu1 %v858_v38, %s1386_s29  ;;  %s1244_s29 = sshll.u32 %s1460_s13, 8  ;;  %s1129_s13 = scalar_lea.sflag [#allocation4], %s323_s28 }
 0x187   : > { %s1810_s24 = scalar_lea.hbm %s1863_s9, %s1244_s29 }
 0x18a   : > { %1022 = vperm.xlu0 %1302, %v1230_v40   ;;  %983 = vperm.xlu1 %1303, %v391_v41   ;;  %v763_v40 = vsel %vm398_vm14, %v1683_v36, 0.0  ;;  %vm965_vm14 = vcmask 982016  }
 0x18e   : > { %1055 = vperm.xlu0 %1302, %v1232_v42   ;;  %961 = vrot.lane.b32.xlu1 %v1680_v20, %s1387_s17  ;;  %s1306_s17 = scalar_lea.vmem %s1812_s21, 256 }
 0x18f   : > { %p1307_p11 = scmp.ne.s32.totalorder %s1812_s21, %s1306_s17  ;;  %p1314_p1 = scmp.lt.s32.totalorder %s1312_s27, %s1306_s17 }
 0x191   : > { %p1308_p12 = pnand %p1307_p11, %p1477_p5  ;;  %p1315_p2 = por %p1314_p1, %p1313_p0 }
 0x192   : > { %1099 = vperm.xlu0 %1302, %v1234_v46   ;;  %997 = vperm.xlu1 %1303, %v374_v43   ;;  %v770_v46 = vmul.f32 %v768_v54, %v763_v40 }
 0x193   : > { %p1309_p13 = pneg %p1308_p12 }
 0x195   : > { %p1316_p3 = pnand %p1315_p2, %p1309_p13 }
 0x196   : > { %1013 = vperm.xlu1 %1303, %v1229_v47  }
 0x19a   : > { %1033 = vperm.xlu1 %1303, %v1231_v49  }
 0x19e   : > { %1077 = vperm.xlu1 %1303, %v1233_v50  }
 0x1a2   : > { %1119 = vperm.xlu1 %1303, %v392_v53  }
 0x1cc   : > { %v810_v59 = vpop.permute.xlu1 %809  ;;  %v784_v34 = vpop.permute.xlu0 %783 }
 0x1d0   : > { %v836_v44 = vpop.permute.xlu1 %835  ;;  %v1742_v62 = vpop.permute.xlu0 %885 }
 0x1d4   : > { %v1740_v61 = vpop.permute.xlu1 %911  ;;  %v1746_v63 = vpop.permute.xlu0 %937 }
 0x1d8   : > { %v1744_v7 = vpop.permute.xlu1 %868  ;;  %v808_v2 = vpop.permute.xlu0 %807 }
 0x1d9   : > { %v813_v12 = vsel %vm811_vm11, %v808_v2, %v810_v59 }
 0x1da   : > { %v817_v41 = vsel %vm411_vm15, %v813_v12, 0.0  ;;  %vm443_vm15 = vcmp.lt.s32.totalorder %v1749_v52, 12 }
 0x1db   : > { %v824_v50 = vmul.f32 %v821_v56, %v817_v41 }
 0x1dc   : > { %v780_v0 = vpop.permute.xlu1 %779  ;;  %v834_v48 = vpop.permute.xlu0 %833 }
 0x1dd   : > { %v839_v43 = vsel %vm837_vm0, %v834_v48, %v836_v44 }
 0x1e0   : > { %v782_v1 = vpop.permute.xlu1 %781  ;;  %v882_v45 = vpop.permute.xlu0 %881 }
 0x1e1   : > { %v787_v5 = vsel %vm785_vm8, %v782_v1, %v784_v34  ;;  %v786_v60 = vsel %vm785_vm8, %v780_v0, %v782_v1  ;;  %v843_v34 = vsel %vm417_vm2, %v839_v43, 0.0  ;;  %vm939_vm8 = vcmask 990208  }
 0x1e2   : > { %v791_v22 = vsel %vm405_vm9, %v787_v5, 0.0  ;;  %v790_v24 = vsel %vm404_vm10, %v786_v60, 0.0  ;;  %vm430_vm9 = vcmp.lt.s32.totalorder %v1751_v10, 14  ;;  %vm431_vm10 = vcmp.lt.s32.totalorder %v1749_v52, 14 }
 0x1e3   : > { %v798_v17 = vmul.f32 %v795_v55, %v791_v22  ;;  %v797_v37 = vmul.f32 %v795_v55, %v790_v24 }
 0x1e4   : > { %v806_v39 = vpop.permute.xlu1 %805  ;;  %v910_v9 = vpop.permute.xlu0 %909 }
 0x1e5   : > { %v812_v16 = vsel %vm811_vm11, %v806_v39, %v808_v2  ;;  %v800_v47 = vadd.f32 %v798_v17, %v771_v13  ;;  %v799_v53 = vadd.f32 %v797_v37, %v770_v46  ;;  %v850_v2 = vmul.f32 %v1730_v23, %v843_v34 }
 0x1e6   : > { %v816_v11 = vsel %vm410_vm13, %v812_v16, 0.0  ;;  %vm437_vm11 = vcmp.lt.s32.totalorder %v1749_v52, 13  ;;  %vm442_vm13 = vcmp.lt.s32.totalorder %v1751_v10, 12 }
 0x1e7   : > { %v823_v49 = vmul.f32 %v821_v56, %v816_v11  ;;  %v826_v0 = vadd.f32 %v824_v50, %v800_v47 }
 0x1e8   : > { %v832_v6 = vpop.permute.xlu1 %831  ;;  %v934_v38 = vpop.permute.xlu0 %933 }
 0x1e9   : > { %v838_v35 = vsel %vm837_vm0, %v832_v6, %v834_v48  ;;  %v825_v36 = vadd.f32 %v823_v49, %v799_v53  ;;  %v852_v8 = vadd.f32 %v850_v2, %v826_v0 }
 0x1ea   : > { %v842_v42 = vsel %vm416_vm1, %v838_v35, 0.0 }
 0x1eb   : > { %v849_v20 = vmul.f32 %v1730_v23, %v842_v42 }
 0x1ec   : > { %v884_v4 = vpop.permute.xlu1 %883  ;;  %v867_v55 = vpop.permute.xlu0 %866 }
 0x1ed   : > { %v888_v54 = vsel %vm887_vm3, %v882_v45, %v884_v4  ;;  %v889_v44 = vsel %vm887_vm3, %v884_v4, %v1742_v62  ;;  %v851_v56 = vadd.f32 %v849_v20, %v825_v36  ;;  %v872_v39 = vsel %vm870_vm4, %v867_v55, %v1744_v7 }
 0x1ee   : > { %v892_v48 = vsel %vm424_vm5, %v888_v54, 0.0  ;;  %v893_v6 = vsel %vm425_vm6, %v889_v44, 0.0  ;;  %v915_v45 = vsel %vm913_vm7, %v910_v9, %v1740_v61  ;;  %v876_v62 = vadd.f32 %v872_v39, %v852_v8 }
 0x1ef   : > { %v899_v23 = vmul.f32 %v1732_v27, %v892_v48  ;;  %v900_v4 = vmul.f32 %v1732_v27, %v893_v6  ;;  %v919_v24 = vsel %vm431_vm10, %v915_v45, 0.0 }
 0x1f0   : > { %v908_v51 = vpop.permute.xlu1 %907  ;;  %v960_v60 = vpop.permute.xlu0 %959  ;;  %v926_v27 = vmul.f32 %v1734_v21, %v919_v24 }
 0x1f1   : > { %v914_v3 = vsel %vm913_vm7, %v908_v51, %v910_v9  ;;  %v902_v35 = vadd.f32 %v900_v4, %v876_v62 }
 0x1f2   : > { %v918_v22 = vsel %vm430_vm9, %v914_v3, 0.0 }
 0x1f3   : > { %v925_v61 = vmul.f32 %v1734_v21, %v918_v22  ;;  %v928_v13 = vadd.f32 %v926_v27, %v902_v35 }
 0x1f4   : > { %v936_v14 = vpop.permute.xlu1 %935  ;;  %v964_v11 = vpop.permute.xlu0 %963 }
 0x1f5   : > { %v941_v7 = vsel %vm939_vm8, %v936_v14, %v1746_v63  ;;  %v940_v16 = vsel %vm939_vm8, %v934_v38, %v936_v14 }
 0x1f6   : > { %v945_v12 = vsel %vm437_vm11, %v941_v7, 0.0  ;;  %v944_v9 = vsel %vm436_vm12, %v940_v16, 0.0 }
 0x1f7   : > { %v952_v63 = vmul.f32 %v1736_v57, %v945_v12  ;;  %v951_v37 = vmul.f32 %v1736_v57, %v944_v9 }
 0x1f8   : > { %v865_v59 = vpop.permute.xlu1 %864 }
 0x1f9   : > { %v871_v1 = vsel %vm870_vm4, %v865_v59, %v867_v55  ;;  %v954_v46 = vadd.f32 %v952_v63, %v928_v13 }
 0x1fa   : > { %v875_v5 = vadd.f32 %v871_v1, %v851_v56 }
 0x1fc   : > { %v901_v51 = vadd.f32 %v899_v23, %v875_v5 }
 0x1fe   : > { %v927_v15 = vadd.f32 %v925_v61, %v901_v51 }
 0x200   : > { %v953_v43 = vadd.f32 %v951_v37, %v927_v15 }
 0x205   : > { %v1005_v34 = vpop.permute.xlu0 %1004 }
 0x206   : > { %v1007_v54 = vmul.f32 %v1005_v34, %v1546_v28  ;;  %v1008_v44 = vmul.f32 %v1005_v34, %v1549_v29 }
 0x209   : > { %v984_v17 = vpop.permute.xlu1 %983  ;;  %v1023_v2 = vpop.permute.xlu0 %1022 }
 0x20a   : > { %v1025_v8 = vmul.f32 %v1023_v2, %v1558_v32 }
 0x20d   : > { %v962_v14 = vpop.permute.xlu1 %961 }
 0x20e   : > { %v966_v38 = vsel %vm965_vm14, %v960_v60, %v962_v14  ;;  %v967_v40 = vsel %vm965_vm14, %v962_v14, %v964_v11 }
 0x20f   : > { %v970_v41 = vsel %vm442_vm13, %v966_v38, 0.0  ;;  %v971_v42 = vsel %vm443_vm15, %v967_v40, 0.0 }
 0x210   : > { %v977_v10 = vmul.f32 %v1738_v58, %v970_v41  ;;  %v978_v21 = vmul.f32 %v1738_v58, %v971_v42 }
 0x211   : > { %v998_v50 = vpop.permute.xlu1 %997 }
 0x212   : > { %v979_v47 = vadd.f32 %v977_v10, %v953_v43  ;;  %v980_v49 = vadd.f32 %v978_v21, %v954_v46  ;;  %v1000_v55 = vmul.f32 %v998_v50, %v1540_v25  ;;  %v1001_v0 = vmul.f32 %v998_v50, %v1543_v26 }
 0x213   : > { %v1026_v25 = vmul.f32 %v1023_v2, %v1561_v33 }
 0x214   : > { %v986_v53 = vadd.f32 %v984_v17, %v979_v47  ;;  %v987_v52 = vadd.f32 %v984_v17, %v980_v49  ;;  %v1009_v56 = vadd.f32 %v1007_v54, %v1000_v55  ;;  %v1010_v39 = vadd.f32 %v1008_v44, %v1001_v0 }
 0x215   : > { %v1014_v57 = vpop.permute.xlu1 %1013 }
 0x216   : > { %v988_v20 = vmax.f32 %v986_v53, 0.0  ;;  %v989_v59 = vmax.f32 %v987_v52, 0.0  ;;  %v1016_v58 = vmul.f32 %v1014_v57, %v1552_v30  ;;  %v1017_v1 = vmul.f32 %v1014_v57, %v1555_v31  ;;  %v1056_v31 = vpop.permute.xlu0 %1055 }
 0x218   : > { %v992_v36 = vcombine.low %v988_v20, %v989_v59  ;;  %v1018_v48 = vadd.f32 %v1016_v58, %v1009_v56  ;;  %v1019_v6 = vadd.f32 %v1017_v1, %v1010_v39 }
 0x219   : > { %v1034_v5 = vpop.permute.xlu1 %1033 }
 0x21a   : > { %994 = vst [vmem:[#allocation2 + $0x4] sm:$0xff] %v992_v36  ;;  %v1027_v62 = vadd.f32 %v1025_v8, %v1018_v48  ;;  %v1028_v23 = vadd.f32 %v1026_v25, %v1019_v6  ;;  %v1100_v11 = vpop.permute.xlu0 %1099 }
 0x21d   : > { %v1078_v61 = vpop.permute.xlu1 %1077 }
 0x221   : > { %v1096_v3 = vld [vmem:[#allocation2 + $0x7] ss:$4 sm:$0x3]  ;;  %v1030_v26 = vld [vmem:[#allocation2 + $0x4] ss:$4 sm:$0x3]  ;;  %v1120_v40 = vpop.permute.xlu1 %1119 }
 0x222   : > { %v1040_v28 = vrot.slane %v1030_v26, %v1535_v18  ;;  %v1044_v29 = vrot.slane %v1030_v26, %v1537_v19  ;;  %v1052_v30 = vld [vmem:[#allocation2 + $0x5] ss:$4 sm:$0x3]  ;;  %v1074_v45 = vld [vmem:[#allocation2 + $0x6] ss:$4 sm:$0x3]  ;;  %v1106_v16 = vrot.slane %v1096_v3, %v1535_v18  ;;  %v1110_v51 = vrot.slane %v1096_v3, %v1537_v19 }
 0x223   : > { %v1062_v4 = vrot.slane %v1052_v30, %v1535_v18  ;;  %v1066_v32 = vrot.slane %v1052_v30, %v1537_v19  ;;  %v1084_v60 = vrot.slane %v1074_v45, %v1535_v18  ;;  %v1088_v22 = vrot.slane %v1074_v45, %v1537_v19 }
 0x224   : > { %v1047_v7 = vmul.f32 %v1040_v28, %v1034_v5  ;;  %v1048_v33 = vmul.f32 %v1044_v29, %v1034_v5  ;;  %v1113_v14 = vmul.f32 %v1106_v16, %v1100_v11  ;;  %v1114_v13 = vmul.f32 %v1110_v51, %v1100_v11 }
 0x225   : > { %v1069_v17 = vmul.f32 %v1062_v4, %v1056_v31  ;;  %v1070_v35 = vmul.f32 %v1066_v32, %v1056_v31  ;;  %v1091_v63 = vmul.f32 %v1084_v60, %v1078_v61  ;;  %v1092_v15 = vmul.f32 %v1088_v22, %v1078_v61 }
 0x226   : > { %v1049_v24 = vadd.f32 %v1047_v7, %v1027_v62  ;;  %v1050_v12 = vadd.f32 %v1048_v33, %v1028_v23 }
 0x228   : > { %v1071_v9 = vadd.f32 %v1069_v17, %v1049_v24  ;;  %v1072_v27 = vadd.f32 %v1070_v35, %v1050_v12 }
 0x22a   : > { %v1093_v37 = vadd.f32 %v1091_v63, %v1071_v9  ;;  %v1094_v18 = vadd.f32 %v1092_v15, %v1072_v27 }
 0x22c   : > { %v1115_v38 = vadd.f32 %v1113_v14, %v1093_v37  ;;  %v1116_v19 = vadd.f32 %v1114_v13, %v1094_v18 }
 0x22e   : > { %v1122_v41 = vadd.f32 %v1120_v40, %v1115_v38  ;;  %v1123_v42 = vadd.f32 %v1120_v40, %v1116_v19 }
 0x230   : > { %v1124_v46 = vmax.f32 %v1122_v41, 0.0  ;;  %v1125_v43 = vmax.f32 %v1123_v42, 0.0 }
 0x232   : > { %1126 = vst [vmem:[%s325_s16] sm:$0xff] %v1124_v46  ;;  %1127 = vst [vmem:[%s325_s16 + $0x8] sm:$0xff] %v1125_v43 }
 0x233   : > { %1319 = shalt.err (!%p1316_p3)
}
 0x234   : > { %s1320_s28 = scalar_lea.hbm %s1810_s24, 256  ;;  %s1324_s16 = scalar_lea.hbm %s1863_s9, 512 }
 0x235   : > { %p1321_p4 = scmp.ne.s32.totalorder %s1810_s24, %s1320_s28  ;;  %p1325_p9 = scmp.lt.u32.totalorder %s1810_s24, %s1863_s9 }
 0x236   : > { %p1326_p10 = scmp.lt.u32.totalorder %s1324_s16, %s1320_s28  ;;  %p1328_p12 = scmp.lt.u32.totalorder %s1320_s28, %s1810_s24 }
 0x237   : > { %p1322_p7 = pnand %p1321_p4, %p1477_p5 }
 0x238   : > { %p1327_p11 = por %p1326_p10, %p1325_p9 }
 0x239   : > { %p1323_p8 = pneg %p1322_p7 }
 0x23a   : > { %p1329_p13 = por %p1328_p12, %p1327_p11 }
 0x23c   : > { %p1330_p0 = pnand %p1329_p13, %p1323_p8 }
 0x23e   : > { %1333 = shalt.err (!%p1330_p0)
}
 0x23f   : > { %1245 = dma.vmem_to_hbm [thread:$0]  (%p1477_p5), %s1812_s21, 256, %s1810_s24, %s1129_s13  }
 0x240 PF: > { %p1251_p1 = scmp.ge.s32.totalorder %s1368_s12, 2  ;;  %s1155_s17 = sand.u32 1, %s1356_s30  }
 0x241   : > { %s1156_s25 = scalar_lea.sflag [#allocation4], %s1155_s17 }
 0x242   : > { %p1248_p2 = pnand %p1251_p1, %p1481_p6 }
 0x244   : > { %1351 = dma.done.wait (!%p1248_p2), %s1156_s25, 256  }
 0x245   : > { %1353 = vsyncadd (!%p1248_p2), %s1156_s25, 4294967040  ;;  %p19_p3 = scmp.ge.s32.totalorder %s1464_s15, 4   ;;  %s1866_s30 = smov %s1360_s10 }
 0x246   : > { %s1867_s10 = smov %s1364_s11  ;;  %s1868_s11 = smov %s1475_s18 }
 0x247   : > { %s1869_s12 = smov %s1464_s15  ;;  %21 = sbr.rel (!%p19_p3) target bundleno = 3 (0x3), region = 124 }
 0x24e   :  { %1161 = vsyncpa [#allocation4], 1 }
 0x24f   :  { %1163 = vsyncpa [#allocation4 + $0x1], 1 }

</bundles_post_ra>
